<compile_context>
chip_gen: v7x
topology: tpu7x:2x2x1
jax: 0.10.0
libtpu: 0.0.40
codegen_flags: <defaults>
</compile_context>

<pallas_src>
import numpy as np
import jax
import jax.numpy as jnp
from jax.experimental import pallas as pl
from jax.experimental.pallas import tpu as pltpu


# ---------------------------------------------------------------------------
# Gaussian window (same construction as gaussian() in the PyTorch module).
# ---------------------------------------------------------------------------
def gaussian_1d(window_size: int, sigma: float = 1.5) -> np.ndarray:
    g = np.array(
        [np.exp(-((x - window_size // 2) ** 2) / (2.0 * sigma ** 2))
         for x in range(window_size)],
        dtype=np.float32,
    )
    return g / g.sum()


def _band_matrix(n: int, g: np.ndarray, pad: int) -> np.ndarray:
    """M[o, i] = g[i - o + pad] (0 elsewhere) so that (M @ x)[o] = conv(x)[o]
    with zero padding of `pad` on both sides (PyTorch F.conv2d semantics)."""
    ws = int(g.shape[0])
    m = np.zeros((n, n), dtype=np.float32)
    for o in range(n):
        for i in range(max(0, o - pad), min(n, o - pad + ws)):
            m[o, i] = g[i - o + pad]
    return m


# ---------------------------------------------------------------------------
# Kernel
# ---------------------------------------------------------------------------
def make_ssim_kernel(bt: int, H: int, W: int, e_mean: float):
    C1 = 0.01 ** 2
    C2 = 0.03 ** 2
    e_mean = float(e_mean)
    e_mean_sq = e_mean * e_mean

    def kernel(gv_ref, gh_ref, x1_ref, x2_ref, x3_ref, out_ref):
        # gv_ref: (H, H) band matrix, gh_ref: (W, W) band matrix (resident)
        # x*_ref: (bt, H, W) unpadded channel slabs
        # out_ref: (1, H, W) per-step partial ssim map (sum over bt channels)
        gv = gv_ref[...]
        gh = gh_ref[...]

        def blur(x):
            # Depthwise Gaussian conv with zero padding == Gv @ x @ Gh (MXU).
            # TODO(synk): for large W/H, tile these band matmuls into
            # 128-aligned diagonal blocks so wasted band FLOPs stay bounded
            # (and use 128-wide tiles on v5e); optionally cast operands to
            # bf16 with f32 accumulation on v6e/v7x if tolerance allows.
            t = jnp.dot(x, gh, preferred_element_type=jnp.float32)
            return jnp.dot(gv, t, preferred_element_type=jnp.float32)

        acc = jnp.zeros((H, W), jnp.float32)
        for b in range(bt):  # bt is a small compile-time constant
            x1 = x1_ref[b]
            x2 = x2_ref[b]
            x3 = x3_ref[b]

            mu1 = blur(x1)
            mu2 = blur(x2)
            mu3 = blur(x3)
            b11 = blur(x1 * x1)
            b33 = blur(x3 * x3)
            b12 = blur(x1 * x2)

            mu1_sq = mu1 * mu1
            mu3_sq = mu3 * mu3
            mu1_mu2 = mu1 * mu2

            sigma1 = jnp.abs(x1 - mu1)
            sigma2 = jnp.abs(x2 - mu2)
            sigma3 = jnp.abs(x3 - mu3)

            sigma1_sq = b11 - mu1_sq
            sigma3_sq = b33 - mu3_sq
            sigma12 = b12 - mu1_mu2

            # l * c * s with the three divisions fused into one approx recip.
            num = ((2.0 * e_mean * mu1 + C1)
                   * (2.0 * sigma1 * sigma3 + C2)
                   * (sigma12 + C2 / 2.0))
            den = ((mu1_sq + e_mean_sq + C1)
                   * (sigma1_sq + sigma3_sq + C2)
                   * (sigma1 * sigma2 + C2 / 2.0))
            acc = acc + num * pl.reciprocal(den, approx=True)

        out_ref[0, :, :] = acc

    return kernel


# ---------------------------------------------------------------------------
# Sizing helpers (generation-aware VMEM budget)
# ---------------------------------------------------------------------------
def _vmem_capacity_bytes() -> int:
    try:
        return int(pltpu.get_tpu_info().vmem_capacity_bytes)
    except Exception:
        return 64 * 1024 * 1024  # v7x lower bound; safe on all generations


def _pick_bt(B: int, H: int, W: int, cap: int = 8):
    """Largest divisor of B (<= cap) that fits the VMEM budget and keeps the
    grid splittable (nb >= 2) across both TensorCores on v7x."""
    vmem_cap = _vmem_capacity_bytes()
    budget = vmem_cap // 3
    # Per-channel live bytes per step: 3 inputs x 2 pipeline buffers (6 slabs)
    # + ~20 slabs of blur/epilogue temporaries, rounded up to 32 slabs.
    per_chan = 32 * H * W * 4
    fixed = (H * H + W * W + 4 * H * W) * 4  # band matrices + buffered output
    bt = 1
    for d in range(1, B + 1):
        if B % d or d > cap:
            continue
        if B >= 2 and B // d < 2:
            continue  # keep nb >= 2 so both v7x TensorCores get work
        if fixed + d * per_chan <= budget:
            bt = d
    est = fixed + bt * per_chan
    return bt, est, vmem_cap


# ---------------------------------------------------------------------------
# Public wrapper
# ---------------------------------------------------------------------------
def ssim_llie(img1, img2, img3, window_size: int = 11, size_average: bool = True):
    """Pallas TPU implementation of SSIM_LLIE(window_size, size_average)(img1, img2, img3)."""
    N, C, H, W = img1.shape
    pad = window_size // 2
    B = N * C

    # Reproduces the PyTorch call where `size_average` is passed into the
    # `e_mean` positional slot; the map mean is always returned as a scalar.
    e_mean = float(size_average)

    g_np = gaussian_1d(window_size, 1.5)
    gv = jnp.asarray(_band_matrix(H, g_np, pad))       # (H, H), left multiply
    gh = jnp.asarray(_band_matrix(W, g_np, pad).T)     # (W, W), right multiply

    def prep(x):
        return jnp.asarray(x, jnp.float32).reshape(B, H, W)

    p1, p2, p3 = prep(img1), prep(img2), prep(img3)

    # TODO(synk): for 1080p-class images add spatial (row) tiling with an
    # 11-row halo as a second grid axis; for tiny W (< 128) pack several
    # channels side-by-side along the lane axis to fill vregs.
    bt, est, vmem_cap = _pick_bt(B, H, W)
    nb = B // bt

    kernel = make_ssim_kernel(bt, H, W, e_mean)

    x_spec = pl.BlockSpec((bt, H, W), lambda i: (i, 0, 0))
    gv_spec = pl.BlockSpec((H, H), lambda i: (0, 0))
    gh_spec = pl.BlockSpec((W, W), lambda i: (0, 0))

    vmem_limit = int(min(0.9 * vmem_cap, max(32 * 1024 * 1024, 2 * est)))

    partials = pl.pallas_call(
        kernel,
        out_shape=jax.ShapeDtypeStruct((nb, H, W), jnp.float32),
        grid=(nb,),
        in_specs=[gv_spec, gh_spec, x_spec, x_spec, x_spec],
        out_specs=pl.BlockSpec((1, H, W), lambda i: (i, 0, 0)),
        compiler_params=pltpu.CompilerParams(
            dimension_semantics=("parallel",),
            vmem_limit_bytes=vmem_limit),
    )(gv, gh, p1, p2, p3)

    return jnp.sum(partials) / jnp.float32(N * C * H * W)


# ---------------------------------------------------------------------------
# Pure-JAX reference (locks in the PyTorch quirks; used for validation only).
# ---------------------------------------------------------------------------
def ssim_llie_reference(img1, img2, img3, window_size: int = 11,
                        size_average: bool = True):
    N, C, H, W = img1.shape
    pad = window_size // 2
    g = jnp.asarray(gaussian_1d(window_size, 1.5))
    w2d = jnp.outer(g, g)
    kern = jnp.broadcast_to(w2d, (C, 1, window_size, window_size))
    e_mean = float(size_average)

    def conv(x):
        return jax.lax.conv_general_dilated(
            x, kern, window_strides=(1, 1),
            padding=((pad, pad), (pad, pad)),
            feature_group_count=C,
            dimension_numbers=("NCHW", "OIHW", "NCHW"))

    img1 = jnp.asarray(img1, jnp.float32)
    img2 = jnp.asarray(img2, jnp.float32)
    img3 = jnp.asarray(img3, jnp.float32)
    mu1, mu2, mu3 = conv(img1), conv(img2), conv(img3)
    mu1_sq, mu3_sq = mu1 * mu1, mu3 * mu3
    mu1_mu2 = mu1 * mu2
    sigma1 = jnp.abs(img1 - mu1)
    sigma2 = jnp.abs(img2 - mu2)
    sigma3 = jnp.abs(img3 - mu3)
    sigma1_sq = conv(img1 * img1) - mu1_sq
    sigma3_sq = conv(img3 * img3) - mu3_sq
    sigma12 = conv(img1 * img2) - mu1_mu2
    C1, C2 = 0.01 ** 2, 0.03 ** 2
    l = (2 * mu1 * e_mean + C1) / (mu1_sq + e_mean ** 2 + C1)
    c = (2 * sigma1 * sigma3 + C2) / (sigma1_sq + sigma3_sq + C2)
    s = (sigma12 + C2 / 2) / (sigma1 * sigma2 + C2 / 2)
    return jnp.mean(l * c * s)


if __name__ == "__main__":
    key = jax.random.PRNGKey(0)
    k1, k2, k3 = jax.random.split(key, 3)
    N, C, H, W = 2, 4, 16, 16
    img1 = jax.random.uniform(k1, (N, C, H, W), dtype=jnp.float32)
    img2 = jax.random.uniform(k2, (N, C, H, W), dtype=jnp.float32)
    img3 = jax.random.uniform(k3, (N, C, H, W), dtype=jnp.float32)

    out = ssim_llie(img1, img2, img3, window_size=11, size_average=True)
    out = jax.block_until_ready(out)
    assert out.shape == () and bool(jnp.isfinite(out))

    # Loose check vs. pure-JAX reference (approx reciprocal shifts the result
    # at the <~1e-3 relative level).
    ref = float(jax.block_until_ready(
        ssim_llie_reference(img1, img2, img3, 11, True)))
    rel = abs(float(out) - ref) / max(abs(ref), 1e-6)
    assert rel < 5e-2, (float(out), ref)

    print("KERNEL_OK")
</pallas_src>

<mosaic_0001>
module attributes {stable_mosaic.version = 11 : i64} {
  func.func @kernel(%arg0: i32, %arg1: memref<16x16xf32, #tpu.memory_space<vmem>>, %arg2: memref<16x16xf32, #tpu.memory_space<vmem>>, %arg3: memref<4x16x16xf32, #tpu.memory_space<vmem>>, %arg4: memref<4x16x16xf32, #tpu.memory_space<vmem>>, %arg5: memref<4x16x16xf32, #tpu.memory_space<vmem>>, %arg6: memref<1x16x16xf32, #tpu.memory_space<vmem>>) attributes {dimension_semantics = [#tpu.dimension_semantics<parallel>], iteration_bounds = array<i64: 2>, scalar_prefetch = 0 : i64, scratch_operands = 0 : i64, tpu.core_type = #tpu.core_type<tc>, window_params = [{pipeline_mode = #tpu.pipeline_mode<synchronous>, transform_indices = @transform_0, window_bounds = array<i64: 16, 16>}, {pipeline_mode = #tpu.pipeline_mode<synchronous>, transform_indices = @transform_1, window_bounds = array<i64: 16, 16>}, {transform_indices = @transform_2, window_bounds = array<i64: 4, 16, 16>}, {transform_indices = @transform_3, window_bounds = array<i64: 4, 16, 16>}, {transform_indices = @transform_4, window_bounds = array<i64: 4, 16, 16>}, {transform_indices = @transform_5, window_bounds = array<i64: 1, 16, 16>}]} {
    %c0 = arith.constant 0 : index
    %c0_0 = arith.constant 0 : index
    %0 = vector.load %arg1[%c0, %c0_0] : memref<16x16xf32, #tpu.memory_space<vmem>>, vector<16x16xf32>
    %c0_1 = arith.constant 0 : index
    %c0_2 = arith.constant 0 : index
    %1 = vector.load %arg2[%c0_1, %c0_2] : memref<16x16xf32, #tpu.memory_space<vmem>>, vector<16x16xf32>
    %cst = arith.constant 0.000000e+00 : f32
    %2 = vector.broadcast %cst : f32 to vector<16x16xf32>
    %c0_3 = arith.constant 0 : index
    %c0_4 = arith.constant 0 : index
    %c0_5 = arith.constant 0 : index
    %3 = vector.load %arg3[%c0_3, %c0_4, %c0_5] : memref<4x16x16xf32, #tpu.memory_space<vmem>>, vector<1x16x16xf32>
    %4 = vector.shape_cast %3 : vector<1x16x16xf32> to vector<16x16xf32>
    %c0_6 = arith.constant 0 : index
    %c0_7 = arith.constant 0 : index
    %c0_8 = arith.constant 0 : index
    %5 = vector.load %arg4[%c0_6, %c0_7, %c0_8] : memref<4x16x16xf32, #tpu.memory_space<vmem>>, vector<1x16x16xf32>
    %6 = vector.shape_cast %5 : vector<1x16x16xf32> to vector<16x16xf32>
    %c0_9 = arith.constant 0 : index
    %c0_10 = arith.constant 0 : index
    %c0_11 = arith.constant 0 : index
    %7 = vector.load %arg5[%c0_9, %c0_10, %c0_11] : memref<4x16x16xf32, #tpu.memory_space<vmem>>, vector<1x16x16xf32>
    %8 = vector.shape_cast %7 : vector<1x16x16xf32> to vector<16x16xf32>
    %cst_12 = arith.constant dense<0.000000e+00> : vector<16x16xf32>
    %9 = tpu.matmul %4, %1, %cst_12 {dimension_numbers = #tpu.dot_dimension_numbers<[1], [0], [0], [1], [0, 0, 1, 1], [], []>} : vector<16x16xf32>, vector<16x16xf32>, vector<16x16xf32> -> vector<16x16xf32>
    %cst_13 = arith.constant dense<0.000000e+00> : vector<16x16xf32>
    %10 = tpu.matmul %0, %9, %cst_13 {dimension_numbers = #tpu.dot_dimension_numbers<[1], [0], [0], [1], [0, 0, 1, 1], [], []>} : vector<16x16xf32>, vector<16x16xf32>, vector<16x16xf32> -> vector<16x16xf32>
    %cst_14 = arith.constant dense<0.000000e+00> : vector<16x16xf32>
    %11 = tpu.matmul %6, %1, %cst_14 {dimension_numbers = #tpu.dot_dimension_numbers<[1], [0], [0], [1], [0, 0, 1, 1], [], []>} : vector<16x16xf32>, vector<16x16xf32>, vector<16x16xf32> -> vector<16x16xf32>
    %cst_15 = arith.constant dense<0.000000e+00> : vector<16x16xf32>
    %12 = tpu.matmul %0, %11, %cst_15 {dimension_numbers = #tpu.dot_dimension_numbers<[1], [0], [0], [1], [0, 0, 1, 1], [], []>} : vector<16x16xf32>, vector<16x16xf32>, vector<16x16xf32> -> vector<16x16xf32>
    %cst_16 = arith.constant dense<0.000000e+00> : vector<16x16xf32>
    %13 = tpu.matmul %8, %1, %cst_16 {dimension_numbers = #tpu.dot_dimension_numbers<[1], [0], [0], [1], [0, 0, 1, 1], [], []>} : vector<16x16xf32>, vector<16x16xf32>, vector<16x16xf32> -> vector<16x16xf32>
    %cst_17 = arith.constant dense<0.000000e+00> : vector<16x16xf32>
    %14 = tpu.matmul %0, %13, %cst_17 {dimension_numbers = #tpu.dot_dimension_numbers<[1], [0], [0], [1], [0, 0, 1, 1], [], []>} : vector<16x16xf32>, vector<16x16xf32>, vector<16x16xf32> -> vector<16x16xf32>
    %15 = arith.mulf %4, %4 : vector<16x16xf32>
    %cst_18 = arith.constant dense<0.000000e+00> : vector<16x16xf32>
    %16 = tpu.matmul %15, %1, %cst_18 {dimension_numbers = #tpu.dot_dimension_numbers<[1], [0], [0], [1], [0, 0, 1, 1], [], []>} : vector<16x16xf32>, vector<16x16xf32>, vector<16x16xf32> -> vector<16x16xf32>
    %cst_19 = arith.constant dense<0.000000e+00> : vector<16x16xf32>
    %17 = tpu.matmul %0, %16, %cst_19 {dimension_numbers = #tpu.dot_dimension_numbers<[1], [0], [0], [1], [0, 0, 1, 1], [], []>} : vector<16x16xf32>, vector<16x16xf32>, vector<16x16xf32> -> vector<16x16xf32>
    %18 = arith.mulf %8, %8 : vector<16x16xf32>
    %cst_20 = arith.constant dense<0.000000e+00> : vector<16x16xf32>
    %19 = tpu.matmul %18, %1, %cst_20 {dimension_numbers = #tpu.dot_dimension_numbers<[1], [0], [0], [1], [0, 0, 1, 1], [], []>} : vector<16x16xf32>, vector<16x16xf32>, vector<16x16xf32> -> vector<16x16xf32>
    %cst_21 = arith.constant dense<0.000000e+00> : vector<16x16xf32>
    %20 = tpu.matmul %0, %19, %cst_21 {dimension_numbers = #tpu.dot_dimension_numbers<[1], [0], [0], [1], [0, 0, 1, 1], [], []>} : vector<16x16xf32>, vector<16x16xf32>, vector<16x16xf32> -> vector<16x16xf32>
    %21 = arith.mulf %4, %6 : vector<16x16xf32>
    %cst_22 = arith.constant dense<0.000000e+00> : vector<16x16xf32>
    %22 = tpu.matmul %21, %1, %cst_22 {dimension_numbers = #tpu.dot_dimension_numbers<[1], [0], [0], [1], [0, 0, 1, 1], [], []>} : vector<16x16xf32>, vector<16x16xf32>, vector<16x16xf32> -> vector<16x16xf32>
    %cst_23 = arith.constant dense<0.000000e+00> : vector<16x16xf32>
    %23 = tpu.matmul %0, %22, %cst_23 {dimension_numbers = #tpu.dot_dimension_numbers<[1], [0], [0], [1], [0, 0, 1, 1], [], []>} : vector<16x16xf32>, vector<16x16xf32>, vector<16x16xf32> -> vector<16x16xf32>
    %24 = arith.mulf %10, %10 : vector<16x16xf32>
    %25 = arith.mulf %14, %14 : vector<16x16xf32>
    %26 = arith.mulf %10, %12 : vector<16x16xf32>
    %27 = arith.subf %4, %10 : vector<16x16xf32>
    %28 = math.absf %27 : vector<16x16xf32>
    %29 = arith.subf %6, %12 : vector<16x16xf32>
    %30 = math.absf %29 : vector<16x16xf32>
    %31 = arith.subf %8, %14 : vector<16x16xf32>
    %32 = math.absf %31 : vector<16x16xf32>
    %33 = arith.subf %17, %24 : vector<16x16xf32>
    %34 = arith.subf %20, %25 : vector<16x16xf32>
    %35 = arith.subf %23, %26 : vector<16x16xf32>
    %cst_24 = arith.constant 2.000000e+00 : f32
    %36 = vector.broadcast %cst_24 : f32 to vector<16x16xf32>
    %37 = arith.mulf %36, %10 : vector<16x16xf32>
    %cst_25 = arith.constant 9.99999974E-5 : f32
    %38 = vector.broadcast %cst_25 : f32 to vector<16x16xf32>
    %39 = arith.addf %37, %38 : vector<16x16xf32>
    %cst_26 = arith.constant 2.000000e+00 : f32
    %40 = vector.broadcast %cst_26 : f32 to vector<16x16xf32>
    %41 = arith.mulf %40, %28 : vector<16x16xf32>
    %42 = arith.mulf %41, %32 : vector<16x16xf32>
    %cst_27 = arith.constant 8.99999984E-4 : f32
    %43 = vector.broadcast %cst_27 : f32 to vector<16x16xf32>
    %44 = arith.addf %42, %43 : vector<16x16xf32>
    %45 = arith.mulf %39, %44 : vector<16x16xf32>
    %cst_28 = arith.constant 4.500000e-04 : f32
    %46 = vector.broadcast %cst_28 : f32 to vector<16x16xf32>
    %47 = arith.addf %35, %46 : vector<16x16xf32>
    %48 = arith.mulf %45, %47 : vector<16x16xf32>
    %cst_29 = arith.constant 1.000000e+00 : f32
    %49 = vector.broadcast %cst_29 : f32 to vector<16x16xf32>
    %50 = arith.addf %24, %49 : vector<16x16xf32>
    %cst_30 = arith.constant 9.99999974E-5 : f32
    %51 = vector.broadcast %cst_30 : f32 to vector<16x16xf32>
    %52 = arith.addf %50, %51 : vector<16x16xf32>
    %53 = arith.addf %33, %34 : vector<16x16xf32>
    %cst_31 = arith.constant 8.99999984E-4 : f32
    %54 = vector.broadcast %cst_31 : f32 to vector<16x16xf32>
    %55 = arith.addf %53, %54 : vector<16x16xf32>
    %56 = arith.mulf %52, %55 : vector<16x16xf32>
    %57 = arith.mulf %28, %30 : vector<16x16xf32>
    %cst_32 = arith.constant 4.500000e-04 : f32
    %58 = vector.broadcast %cst_32 : f32 to vector<16x16xf32>
    %59 = arith.addf %57, %58 : vector<16x16xf32>
    %60 = arith.mulf %56, %59 : vector<16x16xf32>
    %61 = tpu.reciprocal %60 {approx = true} : vector<16x16xf32> -> vector<16x16xf32>
    %62 = arith.mulf %48, %61 : vector<16x16xf32>
    %63 = arith.addf %2, %62 : vector<16x16xf32>
    %c1 = arith.constant 1 : index
    %c0_33 = arith.constant 0 : index
    %c0_34 = arith.constant 0 : index
    %64 = vector.load %arg3[%c1, %c0_33, %c0_34] : memref<4x16x16xf32, #tpu.memory_space<vmem>>, vector<1x16x16xf32>
    %65 = vector.shape_cast %64 : vector<1x16x16xf32> to vector<16x16xf32>
    %c1_35 = arith.constant 1 : index
    %c0_36 = arith.constant 0 : index
    %c0_37 = arith.constant 0 : index
    %66 = vector.load %arg4[%c1_35, %c0_36, %c0_37] : memref<4x16x16xf32, #tpu.memory_space<vmem>>, vector<1x16x16xf32>
    %67 = vector.shape_cast %66 : vector<1x16x16xf32> to vector<16x16xf32>
    %c1_38 = arith.constant 1 : index
    %c0_39 = arith.constant 0 : index
    %c0_40 = arith.constant 0 : index
    %68 = vector.load %arg5[%c1_38, %c0_39, %c0_40] : memref<4x16x16xf32, #tpu.memory_space<vmem>>, vector<1x16x16xf32>
    %69 = vector.shape_cast %68 : vector<1x16x16xf32> to vector<16x16xf32>
    %cst_41 = arith.constant dense<0.000000e+00> : vector<16x16xf32>
    %70 = tpu.matmul %65, %1, %cst_41 {dimension_numbers = #tpu.dot_dimension_numbers<[1], [0], [0], [1], [0, 0, 1, 1], [], []>} : vector<16x16xf32>, vector<16x16xf32>, vector<16x16xf32> -> vector<16x16xf32>
    %cst_42 = arith.constant dense<0.000000e+00> : vector<16x16xf32>
    %71 = tpu.matmul %0, %70, %cst_42 {dimension_numbers = #tpu.dot_dimension_numbers<[1], [0], [0], [1], [0, 0, 1, 1], [], []>} : vector<16x16xf32>, vector<16x16xf32>, vector<16x16xf32> -> vector<16x16xf32>
    %cst_43 = arith.constant dense<0.000000e+00> : vector<16x16xf32>
    %72 = tpu.matmul %67, %1, %cst_43 {dimension_numbers = #tpu.dot_dimension_numbers<[1], [0], [0], [1], [0, 0, 1, 1], [], []>} : vector<16x16xf32>, vector<16x16xf32>, vector<16x16xf32> -> vector<16x16xf32>
    %cst_44 = arith.constant dense<0.000000e+00> : vector<16x16xf32>
    %73 = tpu.matmul %0, %72, %cst_44 {dimension_numbers = #tpu.dot_dimension_numbers<[1], [0], [0], [1], [0, 0, 1, 1], [], []>} : vector<16x16xf32>, vector<16x16xf32>, vector<16x16xf32> -> vector<16x16xf32>
    %cst_45 = arith.constant dense<0.000000e+00> : vector<16x16xf32>
    %74 = tpu.matmul %69, %1, %cst_45 {dimension_numbers = #tpu.dot_dimension_numbers<[1], [0], [0], [1], [0, 0, 1, 1], [], []>} : vector<16x16xf32>, vector<16x16xf32>, vector<16x16xf32> -> vector<16x16xf32>
    %cst_46 = arith.constant dense<0.000000e+00> : vector<16x16xf32>
    %75 = tpu.matmul %0, %74, %cst_46 {dimension_numbers = #tpu.dot_dimension_numbers<[1], [0], [0], [1], [0, 0, 1, 1], [], []>} : vector<16x16xf32>, vector<16x16xf32>, vector<16x16xf32> -> vector<16x16xf32>
    %76 = arith.mulf %65, %65 : vector<16x16xf32>
    %cst_47 = arith.constant dense<0.000000e+00> : vector<16x16xf32>
    %77 = tpu.matmul %76, %1, %cst_47 {dimension_numbers = #tpu.dot_dimension_numbers<[1], [0], [0], [1], [0, 0, 1, 1], [], []>} : vector<16x16xf32>, vector<16x16xf32>, vector<16x16xf32> -> vector<16x16xf32>
    %cst_48 = arith.constant dense<0.000000e+00> : vector<16x16xf32>
    %78 = tpu.matmul %0, %77, %cst_48 {dimension_numbers = #tpu.dot_dimension_numbers<[1], [0], [0], [1], [0, 0, 1, 1], [], []>} : vector<16x16xf32>, vector<16x16xf32>, vector<16x16xf32> -> vector<16x16xf32>
    %79 = arith.mulf %69, %69 : vector<16x16xf32>
    %cst_49 = arith.constant dense<0.000000e+00> : vector<16x16xf32>
    %80 = tpu.matmul %79, %1, %cst_49 {dimension_numbers = #tpu.dot_dimension_numbers<[1], [0], [0], [1], [0, 0, 1, 1], [], []>} : vector<16x16xf32>, vector<16x16xf32>, vector<16x16xf32> -> vector<16x16xf32>
    %cst_50 = arith.constant dense<0.000000e+00> : vector<16x16xf32>
    %81 = tpu.matmul %0, %80, %cst_50 {dimension_numbers = #tpu.dot_dimension_numbers<[1], [0], [0], [1], [0, 0, 1, 1], [], []>} : vector<16x16xf32>, vector<16x16xf32>, vector<16x16xf32> -> vector<16x16xf32>
    %82 = arith.mulf %65, %67 : vector<16x16xf32>
    %cst_51 = arith.constant dense<0.000000e+00> : vector<16x16xf32>
    %83 = tpu.matmul %82, %1, %cst_51 {dimension_numbers = #tpu.dot_dimension_numbers<[1], [0], [0], [1], [0, 0, 1, 1], [], []>} : vector<16x16xf32>, vector<16x16xf32>, vector<16x16xf32> -> vector<16x16xf32>
    %cst_52 = arith.constant dense<0.000000e+00> : vector<16x16xf32>
    %84 = tpu.matmul %0, %83, %cst_52 {dimension_numbers = #tpu.dot_dimension_numbers<[1], [0], [0], [1], [0, 0, 1, 1], [], []>} : vector<16x16xf32>, vector<16x16xf32>, vector<16x16xf32> -> vector<16x16xf32>
    %85 = arith.mulf %71, %71 : vector<16x16xf32>
    %86 = arith.mulf %75, %75 : vector<16x16xf32>
    %87 = arith.mulf %71, %73 : vector<16x16xf32>
    %88 = arith.subf %65, %71 : vector<16x16xf32>
    %89 = math.absf %88 : vector<16x16xf32>
    %90 = arith.subf %67, %73 : vector<16x16xf32>
    %91 = math.absf %90 : vector<16x16xf32>
    %92 = arith.subf %69, %75 : vector<16x16xf32>
    %93 = math.absf %92 : vector<16x16xf32>
    %94 = arith.subf %78, %85 : vector<16x16xf32>
    %95 = arith.subf %81, %86 : vector<16x16xf32>
    %96 = arith.subf %84, %87 : vector<16x16xf32>
    %cst_53 = arith.constant 2.000000e+00 : f32
    %97 = vector.broadcast %cst_53 : f32 to vector<16x16xf32>
    %98 = arith.mulf %97, %71 : vector<16x16xf32>
    %cst_54 = arith.constant 9.99999974E-5 : f32
    %99 = vector.broadcast %cst_54 : f32 to vector<16x16xf32>
    %100 = arith.addf %98, %99 : vector<16x16xf32>
    %cst_55 = arith.constant 2.000000e+00 : f32
    %101 = vector.broadcast %cst_55 : f32 to vector<16x16xf32>
    %102 = arith.mulf %101, %89 : vector<16x16xf32>
    %103 = arith.mulf %102, %93 : vector<16x16xf32>
    %cst_56 = arith.constant 8.99999984E-4 : f32
    %104 = vector.broadcast %cst_56 : f32 to vector<16x16xf32>
    %105 = arith.addf %103, %104 : vector<16x16xf32>
    %106 = arith.mulf %100, %105 : vector<16x16xf32>
    %cst_57 = arith.constant 4.500000e-04 : f32
    %107 = vector.broadcast %cst_57 : f32 to vector<16x16xf32>
    %108 = arith.addf %96, %107 : vector<16x16xf32>
    %109 = arith.mulf %106, %108 : vector<16x16xf32>
    %cst_58 = arith.constant 1.000000e+00 : f32
    %110 = vector.broadcast %cst_58 : f32 to vector<16x16xf32>
    %111 = arith.addf %85, %110 : vector<16x16xf32>
    %cst_59 = arith.constant 9.99999974E-5 : f32
    %112 = vector.broadcast %cst_59 : f32 to vector<16x16xf32>
    %113 = arith.addf %111, %112 : vector<16x16xf32>
    %114 = arith.addf %94, %95 : vector<16x16xf32>
    %cst_60 = arith.constant 8.99999984E-4 : f32
    %115 = vector.broadcast %cst_60 : f32 to vector<16x16xf32>
    %116 = arith.addf %114, %115 : vector<16x16xf32>
    %117 = arith.mulf %113, %116 : vector<16x16xf32>
    %118 = arith.mulf %89, %91 : vector<16x16xf32>
    %cst_61 = arith.constant 4.500000e-04 : f32
    %119 = vector.broadcast %cst_61 : f32 to vector<16x16xf32>
    %120 = arith.addf %118, %119 : vector<16x16xf32>
    %121 = arith.mulf %117, %120 : vector<16x16xf32>
    %122 = tpu.reciprocal %121 {approx = true} : vector<16x16xf32> -> vector<16x16xf32>
    %123 = arith.mulf %109, %122 : vector<16x16xf32>
    %124 = arith.addf %63, %123 : vector<16x16xf32>
    %c2 = arith.constant 2 : index
    %c0_62 = arith.constant 0 : index
    %c0_63 = arith.constant 0 : index
    %125 = vector.load %arg3[%c2, %c0_62, %c0_63] : memref<4x16x16xf32, #tpu.memory_space<vmem>>, vector<1x16x16xf32>
    %126 = vector.shape_cast %125 : vector<1x16x16xf32> to vector<16x16xf32>
    %c2_64 = arith.constant 2 : index
    %c0_65 = arith.constant 0 : index
    %c0_66 = arith.constant 0 : index
    %127 = vector.load %arg4[%c2_64, %c0_65, %c0_66] : memref<4x16x16xf32, #tpu.memory_space<vmem>>, vector<1x16x16xf32>
    %128 = vector.shape_cast %127 : vector<1x16x16xf32> to vector<16x16xf32>
    %c2_67 = arith.constant 2 : index
    %c0_68 = arith.constant 0 : index
    %c0_69 = arith.constant 0 : index
    %129 = vector.load %arg5[%c2_67, %c0_68, %c0_69] : memref<4x16x16xf32, #tpu.memory_space<vmem>>, vector<1x16x16xf32>
    %130 = vector.shape_cast %129 : vector<1x16x16xf32> to vector<16x16xf32>
    %cst_70 = arith.constant dense<0.000000e+00> : vector<16x16xf32>
    %131 = tpu.matmul %126, %1, %cst_70 {dimension_numbers = #tpu.dot_dimension_numbers<[1], [0], [0], [1], [0, 0, 1, 1], [], []>} : vector<16x16xf32>, vector<16x16xf32>, vector<16x16xf32> -> vector<16x16xf32>
    %cst_71 = arith.constant dense<0.000000e+00> : vector<16x16xf32>
    %132 = tpu.matmul %0, %131, %cst_71 {dimension_numbers = #tpu.dot_dimension_numbers<[1], [0], [0], [1], [0, 0, 1, 1], [], []>} : vector<16x16xf32>, vector<16x16xf32>, vector<16x16xf32> -> vector<16x16xf32>
    %cst_72 = arith.constant dense<0.000000e+00> : vector<16x16xf32>
    %133 = tpu.matmul %128, %1, %cst_72 {dimension_numbers = #tpu.dot_dimension_numbers<[1], [0], [0], [1], [0, 0, 1, 1], [], []>} : vector<16x16xf32>, vector<16x16xf32>, vector<16x16xf32> -> vector<16x16xf32>
    %cst_73 = arith.constant dense<0.000000e+00> : vector<16x16xf32>
    %134 = tpu.matmul %0, %133, %cst_73 {dimension_numbers = #tpu.dot_dimension_numbers<[1], [0], [0], [1], [0, 0, 1, 1], [], []>} : vector<16x16xf32>, vector<16x16xf32>, vector<16x16xf32> -> vector<16x16xf32>
    %cst_74 = arith.constant dense<0.000000e+00> : vector<16x16xf32>
    %135 = tpu.matmul %130, %1, %cst_74 {dimension_numbers = #tpu.dot_dimension_numbers<[1], [0], [0], [1], [0, 0, 1, 1], [], []>} : vector<16x16xf32>, vector<16x16xf32>, vector<16x16xf32> -> vector<16x16xf32>
    %cst_75 = arith.constant dense<0.000000e+00> : vector<16x16xf32>
    %136 = tpu.matmul %0, %135, %cst_75 {dimension_numbers = #tpu.dot_dimension_numbers<[1], [0], [0], [1], [0, 0, 1, 1], [], []>} : vector<16x16xf32>, vector<16x16xf32>, vector<16x16xf32> -> vector<16x16xf32>
    %137 = arith.mulf %126, %126 : vector<16x16xf32>
    %cst_76 = arith.constant dense<0.000000e+00> : vector<16x16xf32>
    %138 = tpu.matmul %137, %1, %cst_76 {dimension_numbers = #tpu.dot_dimension_numbers<[1], [0], [0], [1], [0, 0, 1, 1], [], []>} : vector<16x16xf32>, vector<16x16xf32>, vector<16x16xf32> -> vector<16x16xf32>
    %cst_77 = arith.constant dense<0.000000e+00> : vector<16x16xf32>
    %139 = tpu.matmul %0, %138, %cst_77 {dimension_numbers = #tpu.dot_dimension_numbers<[1], [0], [0], [1], [0, 0, 1, 1], [], []>} : vector<16x16xf32>, vector<16x16xf32>, vector<16x16xf32> -> vector<16x16xf32>
    %140 = arith.mulf %130, %130 : vector<16x16xf32>
    %cst_78 = arith.constant dense<0.000000e+00> : vector<16x16xf32>
    %141 = tpu.matmul %140, %1, %cst_78 {dimension_numbers = #tpu.dot_dimension_numbers<[1], [0], [0], [1], [0, 0, 1, 1], [], []>} : vector<16x16xf32>, vector<16x16xf32>, vector<16x16xf32> -> vector<16x16xf32>
    %cst_79 = arith.constant dense<0.000000e+00> : vector<16x16xf32>
    %142 = tpu.matmul %0, %141, %cst_79 {dimension_numbers = #tpu.dot_dimension_numbers<[1], [0], [0], [1], [0, 0, 1, 1], [], []>} : vector<16x16xf32>, vector<16x16xf32>, vector<16x16xf32> -> vector<16x16xf32>
    %143 = arith.mulf %126, %128 : vector<16x16xf32>
    %cst_80 = arith.constant dense<0.000000e+00> : vector<16x16xf32>
    %144 = tpu.matmul %143, %1, %cst_80 {dimension_numbers = #tpu.dot_dimension_numbers<[1], [0], [0], [1], [0, 0, 1, 1], [], []>} : vector<16x16xf32>, vector<16x16xf32>, vector<16x16xf32> -> vector<16x16xf32>
    %cst_81 = arith.constant dense<0.000000e+00> : vector<16x16xf32>
    %145 = tpu.matmul %0, %144, %cst_81 {dimension_numbers = #tpu.dot_dimension_numbers<[1], [0], [0], [1], [0, 0, 1, 1], [], []>} : vector<16x16xf32>, vector<16x16xf32>, vector<16x16xf32> -> vector<16x16xf32>
    %146 = arith.mulf %132, %132 : vector<16x16xf32>
    %147 = arith.mulf %136, %136 : vector<16x16xf32>
    %148 = arith.mulf %132, %134 : vector<16x16xf32>
    %149 = arith.subf %126, %132 : vector<16x16xf32>
    %150 = math.absf %149 : vector<16x16xf32>
    %151 = arith.subf %128, %134 : vector<16x16xf32>
    %152 = math.absf %151 : vector<16x16xf32>
    %153 = arith.subf %130, %136 : vector<16x16xf32>
    %154 = math.absf %153 : vector<16x16xf32>
    %155 = arith.subf %139, %146 : vector<16x16xf32>
    %156 = arith.subf %142, %147 : vector<16x16xf32>
    %157 = arith.subf %145, %148 : vector<16x16xf32>
    %cst_82 = arith.constant 2.000000e+00 : f32
    %158 = vector.broadcast %cst_82 : f32 to vector<16x16xf32>
    %159 = arith.mulf %158, %132 : vector<16x16xf32>
    %cst_83 = arith.constant 9.99999974E-5 : f32
    %160 = vector.broadcast %cst_83 : f32 to vector<16x16xf32>
    %161 = arith.addf %159, %160 : vector<16x16xf32>
    %cst_84 = arith.constant 2.000000e+00 : f32
    %162 = vector.broadcast %cst_84 : f32 to vector<16x16xf32>
    %163 = arith.mulf %162, %150 : vector<16x16xf32>
    %164 = arith.mulf %163, %154 : vector<16x16xf32>
    %cst_85 = arith.constant 8.99999984E-4 : f32
    %165 = vector.broadcast %cst_85 : f32 to vector<16x16xf32>
    %166 = arith.addf %164, %165 : vector<16x16xf32>
    %167 = arith.mulf %161, %166 : vector<16x16xf32>
    %cst_86 = arith.constant 4.500000e-04 : f32
    %168 = vector.broadcast %cst_86 : f32 to vector<16x16xf32>
    %169 = arith.addf %157, %168 : vector<16x16xf32>
    %170 = arith.mulf %167, %169 : vector<16x16xf32>
    %cst_87 = arith.constant 1.000000e+00 : f32
    %171 = vector.broadcast %cst_87 : f32 to vector<16x16xf32>
    %172 = arith.addf %146, %171 : vector<16x16xf32>
    %cst_88 = arith.constant 9.99999974E-5 : f32
    %173 = vector.broadcast %cst_88 : f32 to vector<16x16xf32>
    %174 = arith.addf %172, %173 : vector<16x16xf32>
    %175 = arith.addf %155, %156 : vector<16x16xf32>
    %cst_89 = arith.constant 8.99999984E-4 : f32
    %176 = vector.broadcast %cst_89 : f32 to vector<16x16xf32>
    %177 = arith.addf %175, %176 : vector<16x16xf32>
    %178 = arith.mulf %174, %177 : vector<16x16xf32>
    %179 = arith.mulf %150, %152 : vector<16x16xf32>
    %cst_90 = arith.constant 4.500000e-04 : f32
    %180 = vector.broadcast %cst_90 : f32 to vector<16x16xf32>
    %181 = arith.addf %179, %180 : vector<16x16xf32>
    %182 = arith.mulf %178, %181 : vector<16x16xf32>
    %183 = tpu.reciprocal %182 {approx = true} : vector<16x16xf32> -> vector<16x16xf32>
    %184 = arith.mulf %170, %183 : vector<16x16xf32>
    %185 = arith.addf %124, %184 : vector<16x16xf32>
    %c3 = arith.constant 3 : index
    %c0_91 = arith.constant 0 : index
    %c0_92 = arith.constant 0 : index
    %186 = vector.load %arg3[%c3, %c0_91, %c0_92] : memref<4x16x16xf32, #tpu.memory_space<vmem>>, vector<1x16x16xf32>
    %187 = vector.shape_cast %186 : vector<1x16x16xf32> to vector<16x16xf32>
    %c3_93 = arith.constant 3 : index
    %c0_94 = arith.constant 0 : index
    %c0_95 = arith.constant 0 : index
    %188 = vector.load %arg4[%c3_93, %c0_94, %c0_95] : memref<4x16x16xf32, #tpu.memory_space<vmem>>, vector<1x16x16xf32>
    %189 = vector.shape_cast %188 : vector<1x16x16xf32> to vector<16x16xf32>
    %c3_96 = arith.constant 3 : index
    %c0_97 = arith.constant 0 : index
    %c0_98 = arith.constant 0 : index
    %190 = vector.load %arg5[%c3_96, %c0_97, %c0_98] : memref<4x16x16xf32, #tpu.memory_space<vmem>>, vector<1x16x16xf32>
    %191 = vector.shape_cast %190 : vector<1x16x16xf32> to vector<16x16xf32>
    %cst_99 = arith.constant dense<0.000000e+00> : vector<16x16xf32>
    %192 = tpu.matmul %187, %1, %cst_99 {dimension_numbers = #tpu.dot_dimension_numbers<[1], [0], [0], [1], [0, 0, 1, 1], [], []>} : vector<16x16xf32>, vector<16x16xf32>, vector<16x16xf32> -> vector<16x16xf32>
    %cst_100 = arith.constant dense<0.000000e+00> : vector<16x16xf32>
    %193 = tpu.matmul %0, %192, %cst_100 {dimension_numbers = #tpu.dot_dimension_numbers<[1], [0], [0], [1], [0, 0, 1, 1], [], []>} : vector<16x16xf32>, vector<16x16xf32>, vector<16x16xf32> -> vector<16x16xf32>
    %cst_101 = arith.constant dense<0.000000e+00> : vector<16x16xf32>
    %194 = tpu.matmul %189, %1, %cst_101 {dimension_numbers = #tpu.dot_dimension_numbers<[1], [0], [0], [1], [0, 0, 1, 1], [], []>} : vector<16x16xf32>, vector<16x16xf32>, vector<16x16xf32> -> vector<16x16xf32>
    %cst_102 = arith.constant dense<0.000000e+00> : vector<16x16xf32>
    %195 = tpu.matmul %0, %194, %cst_102 {dimension_numbers = #tpu.dot_dimension_numbers<[1], [0], [0], [1], [0, 0, 1, 1], [], []>} : vector<16x16xf32>, vector<16x16xf32>, vector<16x16xf32> -> vector<16x16xf32>
    %cst_103 = arith.constant dense<0.000000e+00> : vector<16x16xf32>
    %196 = tpu.matmul %191, %1, %cst_103 {dimension_numbers = #tpu.dot_dimension_numbers<[1], [0], [0], [1], [0, 0, 1, 1], [], []>} : vector<16x16xf32>, vector<16x16xf32>, vector<16x16xf32> -> vector<16x16xf32>
    %cst_104 = arith.constant dense<0.000000e+00> : vector<16x16xf32>
    %197 = tpu.matmul %0, %196, %cst_104 {dimension_numbers = #tpu.dot_dimension_numbers<[1], [0], [0], [1], [0, 0, 1, 1], [], []>} : vector<16x16xf32>, vector<16x16xf32>, vector<16x16xf32> -> vector<16x16xf32>
    %198 = arith.mulf %187, %187 : vector<16x16xf32>
    %cst_105 = arith.constant dense<0.000000e+00> : vector<16x16xf32>
    %199 = tpu.matmul %198, %1, %cst_105 {dimension_numbers = #tpu.dot_dimension_numbers<[1], [0], [0], [1], [0, 0, 1, 1], [], []>} : vector<16x16xf32>, vector<16x16xf32>, vector<16x16xf32> -> vector<16x16xf32>
    %cst_106 = arith.constant dense<0.000000e+00> : vector<16x16xf32>
    %200 = tpu.matmul %0, %199, %cst_106 {dimension_numbers = #tpu.dot_dimension_numbers<[1], [0], [0], [1], [0, 0, 1, 1], [], []>} : vector<16x16xf32>, vector<16x16xf32>, vector<16x16xf32> -> vector<16x16xf32>
    %201 = arith.mulf %191, %191 : vector<16x16xf32>
    %cst_107 = arith.constant dense<0.000000e+00> : vector<16x16xf32>
    %202 = tpu.matmul %201, %1, %cst_107 {dimension_numbers = #tpu.dot_dimension_numbers<[1], [0], [0], [1], [0, 0, 1, 1], [], []>} : vector<16x16xf32>, vector<16x16xf32>, vector<16x16xf32> -> vector<16x16xf32>
    %cst_108 = arith.constant dense<0.000000e+00> : vector<16x16xf32>
    %203 = tpu.matmul %0, %202, %cst_108 {dimension_numbers = #tpu.dot_dimension_numbers<[1], [0], [0], [1], [0, 0, 1, 1], [], []>} : vector<16x16xf32>, vector<16x16xf32>, vector<16x16xf32> -> vector<16x16xf32>
    %204 = arith.mulf %187, %189 : vector<16x16xf32>
    %cst_109 = arith.constant dense<0.000000e+00> : vector<16x16xf32>
    %205 = tpu.matmul %204, %1, %cst_109 {dimension_numbers = #tpu.dot_dimension_numbers<[1], [0], [0], [1], [0, 0, 1, 1], [], []>} : vector<16x16xf32>, vector<16x16xf32>, vector<16x16xf32> -> vector<16x16xf32>
    %cst_110 = arith.constant dense<0.000000e+00> : vector<16x16xf32>
    %206 = tpu.matmul %0, %205, %cst_110 {dimension_numbers = #tpu.dot_dimension_numbers<[1], [0], [0], [1], [0, 0, 1, 1], [], []>} : vector<16x16xf32>, vector<16x16xf32>, vector<16x16xf32> -> vector<16x16xf32>
    %207 = arith.mulf %193, %193 : vector<16x16xf32>
    %208 = arith.mulf %197, %197 : vector<16x16xf32>
    %209 = arith.mulf %193, %195 : vector<16x16xf32>
    %210 = arith.subf %187, %193 : vector<16x16xf32>
    %211 = math.absf %210 : vector<16x16xf32>
    %212 = arith.subf %189, %195 : vector<16x16xf32>
    %213 = math.absf %212 : vector<16x16xf32>
    %214 = arith.subf %191, %197 : vector<16x16xf32>
    %215 = math.absf %214 : vector<16x16xf32>
    %216 = arith.subf %200, %207 : vector<16x16xf32>
    %217 = arith.subf %203, %208 : vector<16x16xf32>
    %218 = arith.subf %206, %209 : vector<16x16xf32>
    %cst_111 = arith.constant 2.000000e+00 : f32
    %219 = vector.broadcast %cst_111 : f32 to vector<16x16xf32>
    %220 = arith.mulf %219, %193 : vector<16x16xf32>
    %cst_112 = arith.constant 9.99999974E-5 : f32
    %221 = vector.broadcast %cst_112 : f32 to vector<16x16xf32>
    %222 = arith.addf %220, %221 : vector<16x16xf32>
    %cst_113 = arith.constant 2.000000e+00 : f32
    %223 = vector.broadcast %cst_113 : f32 to vector<16x16xf32>
    %224 = arith.mulf %223, %211 : vector<16x16xf32>
    %225 = arith.mulf %224, %215 : vector<16x16xf32>
    %cst_114 = arith.constant 8.99999984E-4 : f32
    %226 = vector.broadcast %cst_114 : f32 to vector<16x16xf32>
    %227 = arith.addf %225, %226 : vector<16x16xf32>
    %228 = arith.mulf %222, %227 : vector<16x16xf32>
    %cst_115 = arith.constant 4.500000e-04 : f32
    %229 = vector.broadcast %cst_115 : f32 to vector<16x16xf32>
    %230 = arith.addf %218, %229 : vector<16x16xf32>
    %231 = arith.mulf %228, %230 : vector<16x16xf32>
    %cst_116 = arith.constant 1.000000e+00 : f32
    %232 = vector.broadcast %cst_116 : f32 to vector<16x16xf32>
    %233 = arith.addf %207, %232 : vector<16x16xf32>
    %cst_117 = arith.constant 9.99999974E-5 : f32
    %234 = vector.broadcast %cst_117 : f32 to vector<16x16xf32>
    %235 = arith.addf %233, %234 : vector<16x16xf32>
    %236 = arith.addf %216, %217 : vector<16x16xf32>
    %cst_118 = arith.constant 8.99999984E-4 : f32
    %237 = vector.broadcast %cst_118 : f32 to vector<16x16xf32>
    %238 = arith.addf %236, %237 : vector<16x16xf32>
    %239 = arith.mulf %235, %238 : vector<16x16xf32>
    %240 = arith.mulf %211, %213 : vector<16x16xf32>
    %cst_119 = arith.constant 4.500000e-04 : f32
    %241 = vector.broadcast %cst_119 : f32 to vector<16x16xf32>
    %242 = arith.addf %240, %241 : vector<16x16xf32>
    %243 = arith.mulf %239, %242 : vector<16x16xf32>
    %244 = tpu.reciprocal %243 {approx = true} : vector<16x16xf32> -> vector<16x16xf32>
    %245 = arith.mulf %231, %244 : vector<16x16xf32>
    %246 = arith.addf %185, %245 : vector<16x16xf32>
    %c0_120 = arith.constant 0 : index
    %c0_121 = arith.constant 0 : index
    %c0_122 = arith.constant 0 : index
    %247 = vector.load %arg6[%c0_120, %c0_121, %c0_122] : memref<1x16x16xf32, #tpu.memory_space<vmem>>, vector<1x16x16xf32>
    %248 = vector.shape_cast %247 : vector<1x16x16xf32> to vector<16x16xf32>
    %249 = vector.shape_cast %246 : vector<16x16xf32> to vector<1x16x16xf32>
    tpu.vector_store %arg6[%c0_120, %c0_121, %c0_122], %249 {strides = array<i32>} : memref<1x16x16xf32, #tpu.memory_space<vmem>>, vector<1x16x16xf32>,
    return
  }
  func.func @transform_0(%arg0: i32) -> (i32, i32) {
    %c0_i32 = arith.constant 0 : i32
    %c0_i32_0 = arith.constant 0 : i32
    %c0_i32_1 = arith.constant 0 : i32
    return %c0_i32, %c0_i32_0 : i32, i32
  }
  func.func @transform_1(%arg0: i32) -> (i32, i32) {
    %c0_i32 = arith.constant 0 : i32
    %c0_i32_0 = arith.constant 0 : i32
    %c0_i32_1 = arith.constant 0 : i32
    return %c0_i32, %c0_i32_0 : i32, i32
  }
  func.func @transform_2(%arg0: i32) -> (i32, i32, i32) {
    %c0_i32 = arith.constant 0 : i32
    %c0_i32_0 = arith.constant 0 : i32
    %c0_i32_1 = arith.constant 0 : i32
    return %arg0, %c0_i32, %c0_i32_0 : i32, i32, i32
  }
  func.func @transform_3(%arg0: i32) -> (i32, i32, i32) {
    %c0_i32 = arith.constant 0 : i32
    %c0_i32_0 = arith.constant 0 : i32
    %c0_i32_1 = arith.constant 0 : i32
    return %arg0, %c0_i32, %c0_i32_0 : i32, i32, i32
  }
  func.func @transform_4(%arg0: i32) -> (i32, i32, i32) {
    %c0_i32 = arith.constant 0 : i32
    %c0_i32_0 = arith.constant 0 : i32
    %c0_i32_1 = arith.constant 0 : i32
    return %arg0, %c0_i32, %c0_i32_0 : i32, i32, i32
  }
  func.func @transform_5(%arg0: i32) -> (i32, i32, i32) {
    %c0_i32 = arith.constant 0 : i32
    %c0_i32_0 = arith.constant 0 : i32
    %c0_i32_1 = arith.constant 0 : i32
    return %arg0, %c0_i32, %c0_i32_0 : i32, i32, i32
  }
}

</mosaic_0001>

<bundles_post_ra>
// kernel: tpu_custom_call.1
= control target key start
LH: loop header
LB: loop body
LE: loop exit
PB: predicated region body
PF: predicated region fallthrough
CT: control target
= control target key end

     0   :  { %s6490_s0 = inlined_call_operand.hbm [shape: f32[16,16], index: 0, kind: input, shape index: {}]   ;;  %s6491_s1 = inlined_call_operand.hbm [shape: f32[16,16], index: 1, kind: input, shape index: {}]   ;;  %s6492_s2 = inlined_call_operand.hbm [shape: f32[8,16,16], index: 2, kind: input, shape index: {}]   ;;  %s6493_s3 = inlined_call_operand.hbm [shape: f32[8,16,16], index: 3, kind: input, shape index: {}]   ;;  %s6494_s4 = inlined_call_operand.hbm [shape: f32[8,16,16], index: 4, kind: input, shape index: {}]   ;;  %s6495_s5 = inlined_call_operand.hbm [shape: f32[2,16,16], index: 5, kind: output, shape index: {}]  }
   0x1   :  { %6513 = sst [smem:[#allocation18_spill]] %s6490_s0 }
   0x2   :  { %6514 = sst [smem:[#allocation19_spill]] %s6492_s2 }
   0x3   :  { %6515 = sst [smem:[#allocation20_spill]] %s6493_s3 }
   0x4   :  { %10 = vsyncpa [#allocation3], 0 }
   0x5   :  { %11 = vsyncpa [#allocation6], 0 }
   0x6   :  { %12 = vsyncpa [#allocation4], 0 }
   0x7   :  { %14 = vsyncpa [#allocation4 + $0x1], 0  ;;  %s5787_s18 = smov 0   ;;  %s5789_s19 = smov 0  }
   0x8   :  { %s5791_s20 = smov 0   ;;  %s5793_s21 = smov 0  }
   0x9 LB: > { %6516 = sst [smem:[#allocation15_spill]] %s5741_s20  ;;  %s5808_s22 = sadd.s32 4294967295, %s5745_s21   ;;  %s5745_s21 = sphi %s5793_s21, %s6548_s21   ;;  %s5741_s20 = sphi %s5791_s20, %s6550_s20   ;;  %s5737_s19 = sphi %s5789_s19, %s6552_s19   ;;  %s5733_s18 = sphi %s5787_s18, %s6551_s18  }
   0xa   : > { %s4558_s23 = sadd.s32 4294967294, %s5745_s21   ;;  %s5812_s24 = sadd.s32 1, %s5745_s21  }
   0xb   : > { %6517 = sst [smem:[#allocation16_spill]] %s5812_s24  ;;  %s69_s25 = sadd.s32 1, %s5741_s20 }
   0xc   : > { %s66_s26 = ssub.s32 %s5745_s21, %s5812_s24  ;;  %p76_p0 = scmp.ne.s32.totalorder %s5741_s20, %s5737_s19 }
   0xd   : > { %p67_p1 = scmp.eq.s32.totalorder %s66_s26, 0  ;;  %p77_p2 = scmp.eq.s32.totalorder %s5745_s21, 0 }
   0xe   : > { %p82_p3 = scmp.ne.s32.totalorder %s5737_s19, %s5733_s18  ;;  %p6496_p4 = scmp.eq.s32.totalorder %s5808_s22, 0 }
   0xf   : > { %s5824_s27 = scalar_select %p67_p1, %s5741_s20, %s69_s25  }
  0x10   : > { %p5826_p5 = por %p77_p2, %p76_p0  ;;  %p5832_p6 = por %p6496_p4, %p82_p3 }
  0x11   : > { %6518 = sst [smem:[#allocation17_spill]] %s5824_s27  ;;  %p158_p7 = scmp.eq.s32.totalorder %s5808_s22, 1 }
  0x12   : > { %s6519_s28 = scalar_select %p5826_p5, 1, 0 }
  0x13   : > { %s6520_s29 = scalar_select %p5832_p6, 1, 0 }
  0x14   : > { %p164_p8 = scmp.eq.s32.totalorder %s4558_s23, 1  ;;  %p4559_p9 = scmp.ge.s32.totalorder %s5745_s21, 1 }
  0x15   : > { %p171_p10 = scmp.lt.s32.totalorder %s5745_s21, 3  ;;  %p5839_p11 = por %p158_p7, %p76_p0 }
  0x16   : > { %p5843_p12 = por %p164_p8, %p82_p3  ;;  %s5747_s8 = smov [#allocation2]  }
  0x17   : > { %s6521_s30 = scalar_select %p5839_p11, 1, 0 }
  0x18   : > { %s6522_s6 = scalar_select %p5843_p12, 1, 0 }
  0x19   : > { %p5847_p13 = pnand %p4559_p9, %p171_p10  ;;  %s183_s9 = sshll.u32 %s5747_s8, 4  ;;  %s184_s9 = int_to_ptr.vmem [resolvable:$true] %s183_s9 }
  0x1a   : > { %s210_s11 = sand.u32 1, %s5745_s21   ;;  %s6525_s0 = sld [smem:[#allocation18_spill]] }
  0x1b   : > { %s6523_s7 = scalar_select %p5847_p13, 1, 0 }
  0x1c   : > { %p5444_p1 = pneg %p5847_p13 }
  0x1e   : > { %p5855_p2 = pnand %p5444_p1, %p6496_p4 }
  0x20   : > { %s6524_s10 = scalar_select %p5855_p2, 1, 0 }
  0x21   : > { %s5525_s14 = scalar_lea.hbm %s6525_s0, 256  ;;  %p6504_p8 = pneg %p5855_p2 }
  0x22   : > { %p5526_p7 = scmp.ne.s32.totalorder %s6525_s0, %s5525_s14  ;;  %p5532_p1 = scmp.lt.u32.totalorder %s5525_s14, %s6525_s0 }
  0x24   : > { %p5528_p9 = pnand %p6504_p8, %p5526_p7 }
  0x26   : > { %p5529_p10 = pneg %p5528_p9 }
  0x28   : > { %p5534_p0 = pnand %p5532_p1, %p5529_p10 }
  0x2a   : > { %5537 = shalt.err (!%p5534_p0)
}
  0x2b   : > { %s5538_s25 = scalar_lea.vmem %s184_s9, 256  ;;  %p5546_p11 = scmp.lt.s32.totalorder %s184_s9, %s184_s9 }
  0x2c   : > { %p5539_p4 = scmp.ne.s32.totalorder %s184_s9, %s5538_s25  ;;  %p5547_p6 = scmp.lt.s32.totalorder %s5538_s25, %s5538_s25 }
  0x2e   : > { %p5541_p3 = pnand %p5539_p4, %p6504_p8  ;;  %p5548_p13 = por %p5547_p6, %p5546_p11 }
  0x30   : > { %p5542_p12 = pneg %p5541_p3 }
  0x32   : > { %p5549_p5 = pnand %p5548_p13, %p5542_p12 }
  0x34   : > { %5552 = shalt.err (!%p5549_p5)
}
  0x35   : > { %s6500_s26 = smov 128   ;;  %s6502_s8 = smov 8  }
  0x36   : > { %5447 = dma.hbm_to_vmem [thread:$0]  (!%p5855_p2), %s6525_s0, 256, %s184_s9, [#allocation3], %s6500_s26, %s6500_s26, %s6502_s8  }
  0x37   : > { %p6526_p4 = scmp.ne.s32.totalorder %s6519_s28, 0  ;;  %p6527_p0 = scmp.lt.s32.totalorder %s5745_s21, 2 }
  0x38   : > { %s212_s15 = sand.u32 1, %s5741_s20   ;;  %s5899_s17 = sshll.u32 %s5745_s21, 10 }
  0x39   : > { %p5891_p6 = pnand %p6527_p0, %p6526_p4  ;;  %s5896_s16 = sshll.u32 %s212_s15, 6 }
  0x3a   : > { %s6529_s2 = sld [smem:[#allocation19_spill]]  ;;  %s214_s28 = scalar_lea.vmem [#allocation7], %s5896_s16 }
  0x3b   : > { %s6528_s14 = scalar_select %p5891_p6, 1, 0 }
  0x3c   : > { %s222_s9 = sshll.u32 %s214_s28, 4  ;;  %s5910_s12 = scalar_lea.sflag [#allocation3], %s210_s11  ;;  %s5908_s9 = int_to_ptr.vmem [resolvable:$true] %s222_s9 }
  0x3d   : > { %p5916_p11 = pneg %p5891_p6 }
  0x3f   : > { %s6530_s15 = scalar_select %p5916_p11, 1, 0 }
  0x40   : > { %s5905_s27 = scalar_lea.hbm %s6529_s2, %s5899_s17  ;;  %s5558_s26 = scalar_lea.hbm %s6529_s2, 2048 }
  0x41   : > { %s5553_s13 = scalar_lea.hbm %s5905_s27, 1024  ;;  %p5559_p3 = scmp.lt.u32.totalorder %s5905_s27, %s6529_s2 }
  0x42   : > { %p5554_p5 = scmp.ne.s32.totalorder %s5905_s27, %s5553_s13  ;;  %p5560_p7 = scmp.lt.u32.totalorder %s5558_s26, %s5553_s13 }
  0x43   : > { %p5562_p10 = scmp.lt.u32.totalorder %s5553_s13, %s5905_s27 }
  0x44   : > { %p5556_p12 = pnand %p5916_p11, %p5554_p5  ;;  %p5561_p9 = por %p5560_p7, %p5559_p3 }
  0x46   : > { %p5557_p13 = pneg %p5556_p12  ;;  %p5563_p1 = por %p5562_p10, %p5561_p9 }
  0x48   : > { %p5564_p4 = pnand %p5563_p1, %p5557_p13 }
  0x4a   : > { %5567 = shalt.err (!%p5564_p4)
}
  0x4b   : > { %s5568_s11 = scalar_lea.vmem %s5908_s9, 1024  ;;  %s5750_s23 = smov [#allocation7]  }
  0x4c   : > { %p5569_p0 = scmp.ne.s32.totalorder %s5908_s9, %s5568_s11  ;;  %s5573_s25 = sshll.u32 %s5750_s23, 4  ;;  %s5574_s25 = int_to_ptr.vmem [resolvable:$false] %s5573_s25 }
  0x4d   : > { %s5575_s8 = scalar_lea.vmem %s5574_s25, 2048  ;;  %p5576_p8 = scmp.lt.s32.totalorder %s5908_s9, %s5574_s25 }
  0x4e   : > { %p5571_p5 = pnand %p5569_p0, %p5916_p11  ;;  %p5577_p2 = scmp.lt.s32.totalorder %s5575_s8, %s5568_s11 }
  0x50   : > { %p5572_p12 = pneg %p5571_p5  ;;  %p5578_p3 = por %p5577_p2, %p5576_p8 }
  0x52   : > { %p5579_p7 = pnand %p5578_p3, %p5572_p12 }
  0x54   : > { %5582 = shalt.err (!%p5579_p7)
}
  0x55   : > { %s6531_s26 = smov 8   ;;  %s6532_s13 = smov 128  }
  0x56   : > { %5454 = dma.hbm_to_vmem [thread:$0]  (!%p5891_p6), %s5905_s27, 1024, %s5908_s9, %s5910_s12, %s6532_s13, %s6532_s13, %s6531_s26  }
  0x57   : > { %s6533_s3 = sld [smem:[#allocation20_spill]]  ;;  %s236_s11 = scalar_lea.vmem [#allocation8], %s5896_s16 }
  0x58   : > { %s244_s8 = sshll.u32 %s236_s11, 4  ;;  %s5950_s8 = int_to_ptr.vmem [resolvable:$true] %s244_s8 }
  0x5d   : > { %s5947_s25 = scalar_lea.hbm %s6533_s3, %s5899_s17  ;;  %s5588_s9 = scalar_lea.hbm %s6533_s3, 2048 }
  0x5e   : > { %s5583_s0 = scalar_lea.hbm %s5947_s25, 1024  ;;  %p5589_p9 = scmp.lt.u32.totalorder %s5947_s25, %s6533_s3 }
  0x5f   : > { %p5584_p2 = scmp.ne.s32.totalorder %s5947_s25, %s5583_s0  ;;  %p5590_p10 = scmp.lt.u32.totalorder %s5588_s9, %s5583_s0 }
  0x60   : > { %p5592_p4 = scmp.lt.u32.totalorder %s5583_s0, %s5947_s25 }
  0x61   : > { %p5586_p8 = pnand %p5584_p2, %p5916_p11  ;;  %p5591_p1 = por %p5590_p10, %p5589_p9 }
  0x63   : > { %p5587_p13 = pneg %p5586_p8  ;;  %p5593_p0 = por %p5592_p4, %p5591_p1 }
  0x65   : > { %p5594_p5 = pnand %p5593_p0, %p5587_p13 }
  0x67   : > { %5597 = shalt.err (!%p5594_p5)
}
  0x68   : > { %s5598_s11 = scalar_lea.vmem %s5950_s8, 1024  ;;  %s5751_s2 = smov [#allocation8]  }
  0x69   : > { %p5599_p12 = scmp.ne.s32.totalorder %s5950_s8, %s5598_s11  ;;  %s5603_s27 = sshll.u32 %s5751_s2, 4  ;;  %s5604_s27 = int_to_ptr.vmem [resolvable:$false] %s5603_s27 }
  0x6a   : > { %s5605_s28 = scalar_lea.vmem %s5604_s27, 2048  ;;  %p5606_p2 = scmp.lt.s32.totalorder %s5950_s8, %s5604_s27 }
  0x6b   : > { %p5601_p3 = pnand %p5599_p12, %p5916_p11  ;;  %p5607_p8 = scmp.lt.s32.totalorder %s5605_s28, %s5598_s11 }
  0x6d   : > { %p5602_p7 = pneg %p5601_p3  ;;  %p5608_p9 = por %p5607_p8, %p5606_p2 }
  0x6f   : > { %p5609_p10 = pnand %p5608_p9, %p5602_p7 }
  0x71   : > { %5612 = shalt.err (!%p5609_p10)
}
  0x72   : > { %5457 = dma.hbm_to_vmem [thread:$0]  (!%p5891_p6), %s5947_s25, 1024, %s5950_s8, %s5910_s12, %s6532_s13, %s6532_s13, %s6531_s26  }
  0x73   : > { %s5752_s0 = smov [#allocation5]   ;;  %s5981_s11 = scalar_lea.hbm %s6494_s4, %s5899_s17 }
  0x74   : > { %s196_s9 = sshll.u32 %s5752_s0, 4  ;;  %s5613_s3 = scalar_lea.hbm %s6491_s1, 256  ;;  %s197_s9 = int_to_ptr.vmem [resolvable:$true] %s196_s9 }
  0x75   : > { %p5614_p13 = scmp.ne.s32.totalorder %s6491_s1, %s5613_s3  ;;  %p6534_p1 = scmp.ne.s32.totalorder %s6524_s10, 0 }
  0x76   : > { %p5620_p12 = scmp.lt.u32.totalorder %s5613_s3, %s6491_s1 }
  0x77   : > { %p6535_p4 = pneg %p6534_p1 }
  0x79   : > { %p5616_p0 = pnand %p5614_p13, %p6535_p4 }
  0x7b   : > { %p5617_p5 = pneg %p5616_p0 }
  0x7d   : > { %p5622_p3 = pnand %p5620_p12, %p5617_p5 }
  0x7f   : > { %5625 = shalt.err (!%p5622_p3)
}
  0x80   : > { %s5626_s17 = scalar_lea.vmem %s197_s9, 256  ;;  %p6536_p2 = pmov %p6535_p4 }
  0x81   : > { %p5627_p7 = scmp.ne.s32.totalorder %s197_s9, %s5626_s17  ;;  %p5634_p10 = scmp.lt.s32.totalorder %s197_s9, %s197_s9 }
  0x82   : > { %p5635_p6 = scmp.lt.s32.totalorder %s5626_s17, %s5626_s17 }
  0x83   : > { %p5629_p8 = pnand %p5627_p7, %p6536_p2 }
  0x84   : > { %p5636_p11 = por %p5635_p6, %p5634_p10 }
  0x85   : > { %p5630_p9 = pneg %p5629_p8 }
  0x87   : > { %p5637_p4 = pnand %p5636_p11, %p5630_p9 }
  0x89   : > { %5640 = shalt.err (!%p5637_p4)
}
  0x8a   : > { %5450 = dma.hbm_to_vmem [thread:$0]  (!%p6534_p1), %s6491_s1, 256, %s197_s9, [#allocation6], %s6532_s13, %s6532_s13, %s6531_s26  }
  0x8b   : > { %s258_s24 = scalar_lea.vmem [#allocation9], %s5896_s16  ;;  %s5641_s23 = scalar_lea.hbm %s5981_s11, 1024 }
  0x8c   : > { %s266_s0 = sshll.u32 %s258_s24, 4  ;;  %p5642_p6 = scmp.ne.s32.totalorder %s5981_s11, %s5641_s23  ;;  %s6007_s0 = int_to_ptr.vmem [resolvable:$true] %s266_s0 }
  0x8d   : > { %p6537_p11 = scmp.ne.s32.totalorder %s6530_s15, 0  ;;  %s5646_s27 = scalar_lea.hbm %s6494_s4, 2048 }
  0x8e   : > { %p5647_p5 = scmp.lt.u32.totalorder %s5981_s11, %s6494_s4  ;;  %p5648_p12 = scmp.lt.u32.totalorder %s5646_s27, %s5641_s23 }
  0x8f   : > { %p5644_p13 = pnand %p5642_p6, %p6537_p11  ;;  %p5650_p1 = scmp.lt.u32.totalorder %s5641_s23, %s5981_s11 }
  0x90   : > { %p5649_p3 = por %p5648_p12, %p5647_p5 }
  0x91   : > { %p5645_p0 = pneg %p5644_p13 }
  0x92   : > { %p5651_p7 = por %p5650_p1, %p5649_p3 }
  0x94   : > { %p5652_p2 = pnand %p5651_p7, %p5645_p0 }
  0x96   : > { %5655 = shalt.err (!%p5652_p2)
}
  0x97   : > { %s5656_s16 = scalar_lea.vmem %s6007_s0, 1024  ;;  %s5753_s9 = smov [#allocation9]  }
  0x98   : > { %p5657_p8 = scmp.ne.s32.totalorder %s6007_s0, %s5656_s16  ;;  %s5661_s8 = sshll.u32 %s5753_s9, 4  ;;  %s5662_s8 = int_to_ptr.vmem [resolvable:$false] %s5661_s8 }
  0x99   : > { %s5663_s17 = scalar_lea.vmem %s5662_s8, 2048  ;;  %p5664_p4 = scmp.lt.s32.totalorder %s6007_s0, %s5662_s8 }
  0x9a   : > { %p5659_p9 = pnand %p5657_p8, %p6537_p11  ;;  %p5665_p6 = scmp.lt.s32.totalorder %s5663_s17, %s5656_s16 }
  0x9c   : > { %p5660_p10 = pneg %p5659_p9  ;;  %p5666_p13 = por %p5665_p6, %p5664_p4 }
  0x9e   : > { %p5667_p5 = pnand %p5666_p13, %p5660_p10 }
  0xa0   : > { %5670 = shalt.err (!%p5667_p5)
}
  0xa1   : > { %p6538_p0 = scmp.ne.s32.totalorder %s6528_s14, 0  ;;  %p6539_p11 = scmp.ne.s32.totalorder %s6523_s7, 0 }
  0xa2   : > { %p6540_p12 = scmp.eq.s32.totalorder (!%p6539_p11), %s5808_s22, 0 }
  0xa3   : > { %5460 = dma.hbm_to_vmem [thread:$0]  (!%p6538_p0), %s5981_s11, 1024, %s6007_s0, %s5910_s12, %s6532_s13, %s6532_s13, %s6531_s26  }
  0xa4   : > { %278 = sbr.rel (%p6539_p11) target bundleno = 748 (0x2ec), region = 40 }
  0xab   : > { %5716 = dma.done.wait (%p6540_p12), [#allocation3], 256   ;;  %p6541_p3 = pmov %p6540_p12 }
  0xad   : > { %5718 = vsyncadd (%p6541_p3), [#allocation3], 4294967040  ;;  %p6542_p1 = pmov %p6541_p3 }
  0xaf   : > { %5720 = dma.done.wait (%p6542_p1), [#allocation6], 256   ;;  %p6543_p7 = pmov %p6542_p1 }
  0xb0   : > { %s288_s14 = sand.u32 1, %s5808_s22   ;;  %s6046_s12 = sand.u32 1, %s5737_s19  }
  0xb1   : > { %5722 = vsyncadd (%p6543_p7), [#allocation6], 4294967040  ;;  %s4578_s7 = sshll.u32 %s6046_s12, 6  ;;  %s289_s15 = scalar_lea.sflag [#allocation3], %s288_s14 }
  0xb2   : > { %s6049_s26 = scalar_lea.vmem [#allocation7], %s4578_s7  ;;  %p6544_p2 = scmp.ne.s32.totalorder %s6520_s29, 0 }
  0xb4   : > { %5724 = dma.done.wait (%p6544_p2), %s289_s15, 3072  }
  0xb5   : > { %5726 = vsyncadd (%p6544_p2), %s289_s15, 4294964224  ;;  %vm360_vm0 = vcmask 130048   ;;  %v352_v0 = vld [vmem:[#allocation5] sm:$0xff]  ;;  %v353_v1 = vld [vmem:[#allocation5 + $0x8] sm:$0xff]  ;;  %s6068_s29 = scalar_lea.vmem [#allocation8], %s4578_s7  ;;  %s6082_s13 = scalar_lea.vmem [#allocation9], %s4578_s7 }
  0xb6   : > { %v6056_v2 = vld [vmem:[%s6049_s26] sm:$0xff]  ;;  %v6058_v3 = vpack.c.bf16 %v353_v1, %v352_v0  ;;  %v6065_v4 = vld [vmem:[%s6049_s26 + $0x8] sm:$0xff]  ;;  %v6122_v15 = vld [vmem:[%s6049_s26 + $0x10] sm:$0xff]  ;;  %s4581_s11 = sshll.u32 %s6046_s12, 4  ;;  %s4707_s3 = sshll.u32 %s5808_s22, 8 }
  0xb7   : > { %4904 = vmatprep.mubr.msk.f32.mxu0 %vm360_vm0, %v6056_v2  ;;  %v6071_v5 = vld [vmem:[%s6068_s29] sm:$0xff]  ;;  %v6079_v6 = vld [vmem:[%s6068_s29 + $0x8] sm:$0xff]  ;;  %v835_v9 = vmul.f32 %v6056_v2, %v6056_v2  ;;  %v836_v10 = vmul.f32 %v6065_v4, %v6065_v4  ;;  %v6129_v16 = vld [vmem:[%s6049_s26 + $0x18] sm:$0xff]  ;;  %v1848_v21 = vmul.f32 %v6122_v15, %v6122_v15  ;;  %s346_s20 = scalar_lea.vmem [#allocation10], %s4581_s11  ;;  %s6442_s10 = scalar_lea.hbm %s6495_s5, %s4707_s3 }
  0xb8   : > { %5237 = vmatprep.subr.bf16.mxu0 %v6058_v3  ;;  %v6085_v7 = vld [vmem:[%s6082_s13] sm:$0xff]  ;;  %v6093_v8 = vld [vmem:[%s6082_s13 + $0x8] sm:$0xff]  ;;  %v1151_v13 = vmul.f32 %v6071_v5, %v6056_v2  ;;  %v1152_v14 = vmul.f32 %v6079_v6, %v6065_v4  ;;  %v6133_v17 = vld [vmem:[%s6068_s29 + $0x10] sm:$0xff]  ;;  %v1849_v22 = vmul.f32 %v6129_v16, %v6129_v16  ;;  %s4426_s24 = sshll.u32 %s346_s20, 4  ;;  %s4413_s22 = scalar_lea.sflag [#allocation4], %s6046_s12  ;;  %s6444_s24 = int_to_ptr.vmem [resolvable:$true] %s4426_s24 }
  0xb9   : > { %5239 = vmatpush3.bf16.msra.mxu0 %v6058_v3  ;;  %v993_v11 = vmul.f32 %v6085_v7, %v6085_v7  ;;  %v994_v12 = vmul.f32 %v6093_v8, %v6093_v8  ;;  %v6141_v18 = vld [vmem:[%s6068_s29 + $0x18] sm:$0xff]  ;;  %v6145_v19 = vld [vmem:[%s6082_s13 + $0x10] sm:$0xff]  ;;  %v2164_v25 = vmul.f32 %v6133_v17, %v6122_v15  ;;  %v6182_v27 = vld [vmem:[%s6049_s26 + $0x20] sm:$0xff]  ;;  %s5671_s2 = scalar_lea.vmem %s6444_s24, 256  ;;  %p6545_p9 = scmp.ne.s32.totalorder %s6521_s30, 0 }
  0xba   : > { %5245 = vmatprep.subr.bf16.mxu0 %v6058_v3  ;;  %v6153_v20 = vld [vmem:[%s6082_s13 + $0x18] sm:$0xff]  ;;  %v2006_v23 = vmul.f32 %v6145_v19, %v6145_v19  ;;  %v2165_v26 = vmul.f32 %v6141_v18, %v6129_v16  ;;  %v6189_v28 = vld [vmem:[%s6049_s26 + $0x28] sm:$0xff]  ;;  %v6193_v29 = vld [vmem:[%s6068_s29 + $0x20] sm:$0xff]  ;;  %v2861_v33 = vmul.f32 %v6182_v27, %v6182_v27  ;;  %p5672_p8 = scmp.ne.s32.totalorder %s6444_s24, %s5671_s2  ;;  %s5754_s27 = smov [#allocation10]  }
  0xbb   : > { %v2007_v24 = vmul.f32 %v6153_v20, %v6153_v20  ;;  %v6201_v30 = vld [vmem:[%s6068_s29 + $0x28] sm:$0xff]  ;;  %v6205_v31 = vld [vmem:[%s6082_s13 + $0x20] sm:$0xff]  ;;  %v2862_v34 = vmul.f32 %v6189_v28, %v6189_v28  ;;  %v3177_v37 = vmul.f32 %v6193_v29, %v6182_v27  ;;  %v6242_v39 = vld [vmem:[%s6049_s26 + $0x30] sm:$0xff]  ;;  %s5675_s28 = sshll.u32 %s5754_s27, 4  ;;  %s5676_s28 = int_to_ptr.vmem [resolvable:$false] %s5675_s28 }
  0xbc   : > { %4905 = vmatmul.mubr.msk.f32.vlgmr.msra.gmra.mrb[0].mxu0 %vm360_vm0, %v6065_v4  ;;  %v6213_v32 = vld [vmem:[%s6082_s13 + $0x28] sm:$0xff]  ;;  %v3019_v35 = vmul.f32 %v6205_v31, %v6205_v31  ;;  %v3178_v38 = vmul.f32 %v6201_v30, %v6189_v28  ;;  %v6249_v40 = vld [vmem:[%s6049_s26 + $0x38] sm:$0xff]  ;;  %v6253_v41 = vld [vmem:[%s6068_s29 + $0x30] sm:$0xff]  ;;  %v3874_v45 = vmul.f32 %v6242_v39, %v6242_v39  ;;  %p5673_p10 = pnand %p5672_p8, %p6545_p9  ;;  %s5677_s25 = scalar_lea.vmem %s5676_s28, 512 }
  0xbd   : > { %5247 = vmatpush3.bf16.msra.mxu0 %v6058_v3  ;;  %4918 = vmatprep.mubr.msk.f32.mxu0 %vm360_vm0, %v6071_v5  ;;  %v3020_v36 = vmul.f32 %v6213_v32, %v6213_v32  ;;  %v6261_v42 = vld [vmem:[%s6068_s29 + $0x38] sm:$0xff]  ;;  %v6265_v43 = vld [vmem:[%s6082_s13 + $0x30] sm:$0xff]  ;;  %v3875_v46 = vmul.f32 %v6249_v40, %v6249_v40  ;;  %v4190_v49 = vmul.f32 %v6253_v41, %v6242_v39  ;;  %v6300_v51 = vld [vmem:[#allocation2] sm:$0xff]  ;;  %p5678_p6 = scmp.lt.s32.totalorder %s6444_s24, %s5676_s28  ;;  %p5679_p13 = scmp.lt.s32.totalorder %s5677_s25, %s5671_s2 }
  0xbe   : > { %5253 = vmatprep.subr.bf16.mxu0 %v6058_v3  ;;  %v6273_v44 = vld [vmem:[%s6082_s13 + $0x38] sm:$0xff]  ;;  %v4032_v47 = vmul.f32 %v6265_v43, %v6265_v43  ;;  %v4191_v50 = vmul.f32 %v6261_v42, %v6249_v40  ;;  %4911 = vmatprep.mubr.msk.f32.mxu1 %vm360_vm0, %v6300_v51  ;;  %v6305_v57 = vld [vmem:[#allocation2 + $0x8] sm:$0xff]  ;;  %p5674_p4 = pneg %p5673_p10 }
  0xbf   : > { %v4033_v48 = vmul.f32 %v6273_v44, %v6273_v44  ;;  %p5680_p5 = por %p5679_p13, %p5678_p6 }
  0xc0   : > { %4919 = vmatmul.mubr.msk.f32.vlgmr.msra.gmra.mrb[2].mxu0 %vm360_vm0, %v6079_v6 }
  0xc1   : > { %5255 = vmatpush3.bf16.msra.mxu0 %v6058_v3  ;;  %4932 = vmatprep.mubr.msk.f32.mxu0 %vm360_vm0, %v6085_v7  ;;  %p5681_p0 = pnand %p5680_p5, %p5674_p4 }
  0xc2   : > { %5261 = vmatprep.subr.bf16.mxu0 %v6058_v3 }
  0xc4   : > { %4933 = vmatmul.mubr.msk.f32.vlgmr.msra.gmra.mrb[4].mxu0 %vm360_vm0, %v6093_v8 }
  0xc5   : > { %5263 = vmatpush3.bf16.msra.mxu0 %v6058_v3  ;;  %4946 = vmatprep.mubr.msk.f32.mxu0 %vm360_vm0, %v835_v9 }
  0xc6   : > { %5269 = vmatprep.subr.bf16.mxu0 %v6058_v3 }
  0xc8   : > { %4947 = vmatmul.mubr.msk.f32.vlgmr.msra.gmra.mrb[6].mxu0 %vm360_vm0, %v836_v10 }
  0xc9   : > { %5271 = vmatpush3.bf16.msra.mxu0 %v6058_v3  ;;  %4960 = vmatprep.mubr.msk.f32.mxu0 %vm360_vm0, %v993_v11 }
  0xca   : > { %5277 = vmatprep.subr.bf16.mxu0 %v6058_v3 }
  0xcc   : > { %4961 = vmatmul.mubr.msk.f32.vlgmr.msra.gmra.mrb[8].mxu0 %vm360_vm0, %v994_v12 }
  0xcd   : > { %5279 = vmatpush3.bf16.msra.mxu0 %v6058_v3  ;;  %4974 = vmatprep.mubr.msk.f32.mxu0 %vm360_vm0, %v1151_v13 }
  0xce   : > { %5285 = vmatprep.subr.bf16.mxu0 %v6058_v3 }
  0xd0   : > { %4975 = vmatmul.mubr.msk.f32.vlgmr.msra.gmra.mrb[10].mxu0 %vm360_vm0, %v1152_v14 }
  0xd1   : > { %5287 = vmatpush3.bf16.msra.mxu0 %v6058_v3  ;;  %4988 = vmatprep.mubr.msk.f32.mxu0 %vm360_vm0, %v6122_v15 }
  0xd2   : > { %5293 = vmatprep.subr.bf16.mxu0 %v6058_v3 }
  0xd4   : > { %4989 = vmatmul.mubr.msk.f32.vlgmr.msra.gmra.mrb[12].mxu0 %vm360_vm0, %v6129_v16 }
  0xd5   : > { %5295 = vmatpush3.bf16.msra.mxu0 %v6058_v3  ;;  %5002 = vmatprep.mubr.msk.f32.mxu0 %vm360_vm0, %v6133_v17 }
  0xd6   : > { %5301 = vmatprep.subr.bf16.mxu0 %v6058_v3 }
  0xd8   : > { %5003 = vmatmul.mubr.msk.f32.vlgmr.msra.gmra.mrb[14].mxu0 %vm360_vm0, %v6141_v18 }
  0xd9   : > { %5303 = vmatpush3.bf16.msra.mxu0 %v6058_v3  ;;  %5016 = vmatprep.mubr.msk.f32.mxu0 %vm360_vm0, %v6145_v19 }
  0xda   : > { %5309 = vmatprep.subr.bf16.mxu0 %v6058_v3 }
  0xdc   : > { %5017 = vmatmul.mubr.msk.f32.vlgmr.msra.gmra.mrb[16].mxu0 %vm360_vm0, %v6153_v20 }
  0xdd   : > { %5311 = vmatpush3.bf16.msra.mxu0 %v6058_v3  ;;  %5030 = vmatprep.mubr.msk.f32.mxu0 %vm360_vm0, %v1848_v21 }
  0xde   : > { %5317 = vmatprep.subr.bf16.mxu0 %v6058_v3 }
  0xe0   : > { %5031 = vmatmul.mubr.msk.f32.vlgmr.msra.gmra.mrb[18].mxu0 %vm360_vm0, %v1849_v22 }
  0xe1   : > { %5319 = vmatpush3.bf16.msra.mxu0 %v6058_v3  ;;  %5044 = vmatprep.mubr.msk.f32.mxu0 %vm360_vm0, %v2006_v23 }
  0xe2   : > { %5325 = vmatprep.subr.bf16.mxu0 %v6058_v3 }
  0xe4   : > { %5045 = vmatmul.mubr.msk.f32.vlgmr.msra.gmra.mrb[20].mxu0 %vm360_vm0, %v2007_v24 }
  0xe5   : > { %5327 = vmatpush3.bf16.msra.mxu0 %v6058_v3  ;;  %5058 = vmatprep.mubr.msk.f32.mxu0 %vm360_vm0, %v2164_v25 }
  0xe6   : > { %5333 = vmatprep.subr.bf16.mxu0 %v6058_v3 }
  0xe8   : > { %5059 = vmatmul.mubr.msk.f32.vlgmr.msra.gmra.mrb[22].mxu0 %vm360_vm0, %v2165_v26 }
  0xe9   : > { %5335 = vmatpush3.bf16.msra.mxu0 %v6058_v3  ;;  %5072 = vmatprep.mubr.msk.f32.mxu0 %vm360_vm0, %v6182_v27 }
  0xea   : > { %5341 = vmatprep.subr.bf16.mxu0 %v6058_v3 }
  0xec   : > { %5073 = vmatmul.mubr.msk.f32.vlgmr.msra.gmra.mrb[24].mxu0 %vm360_vm0, %v6189_v28 }
  0xed   : > { %5343 = vmatpush3.bf16.msra.mxu0 %v6058_v3  ;;  %5086 = vmatprep.mubr.msk.f32.mxu0 %vm360_vm0, %v6193_v29 }
  0xee   : > { %5349 = vmatprep.subr.bf16.mxu0 %v6058_v3 }
  0xf0   : > { %5087 = vmatmul.mubr.msk.f32.vlgmr.msra.gmra.mrb[26].mxu0 %vm360_vm0, %v6201_v30 }
  0xf1   : > { %5351 = vmatpush3.bf16.msra.mxu0 %v6058_v3  ;;  %5100 = vmatprep.mubr.msk.f32.mxu0 %vm360_vm0, %v6205_v31 }
  0xf2   : > { %5357 = vmatprep.subr.bf16.mxu0 %v6058_v3 }
  0xf4   : > { %5101 = vmatmul.mubr.msk.f32.vlgmr.msra.gmra.mrb[28].mxu0 %vm360_vm0, %v6213_v32 }
  0xf5   : > { %5359 = vmatpush3.bf16.msra.mxu0 %v6058_v3  ;;  %5114 = vmatprep.mubr.msk.f32.mxu0 %vm360_vm0, %v2861_v33 }
  0xf6   : > { %5365 = vmatprep.subr.bf16.mxu0 %v6058_v3 }
  0xf8   : > { %5115 = vmatmul.mubr.msk.f32.vlgmr.msra.gmra.mrb[30].mxu0 %vm360_vm0, %v2862_v34 }
  0xf9   : > { %5367 = vmatpush3.bf16.msra.mxu0 %v6058_v3  ;;  %5128 = vmatprep.mubr.msk.f32.mxu0 %vm360_vm0, %v3019_v35 }
  0xfa   : > { %5373 = vmatprep.subr.bf16.mxu0 %v6058_v3 }
  0xfc   : > { %5129 = vmatmul.mubr.msk.f32.vlgmr.msra.gmra.mrb[32].mxu0 %vm360_vm0, %v3020_v36 }
  0xfd   : > { %5375 = vmatpush3.bf16.msra.mxu0 %v6058_v3  ;;  %5142 = vmatprep.mubr.msk.f32.mxu0 %vm360_vm0, %v3177_v37 }
  0xfe   : > { %5381 = vmatprep.subr.bf16.mxu0 %v6058_v3 }
 0x100   : > { %5143 = vmatmul.mubr.msk.f32.vlgmr.msra.gmra.mrb[34].mxu0 %vm360_vm0, %v3178_v38 }
 0x101   : > { %5383 = vmatpush3.bf16.msra.mxu0 %v6058_v3  ;;  %5156 = vmatprep.mubr.msk.f32.mxu0 %vm360_vm0, %v6242_v39 }
 0x102   : > { %5389 = vmatprep.subr.bf16.mxu0 %v6058_v3 }
 0x104   : > { %5157 = vmatmul.mubr.msk.f32.vlgmr.msra.gmra.mrb[36].mxu0 %vm360_vm0, %v6249_v40 }
 0x105   : > { %5391 = vmatpush3.bf16.msra.mxu0 %v6058_v3  ;;  %5170 = vmatprep.mubr.msk.f32.mxu0 %vm360_vm0, %v6253_v41 }
 0x106   : > { %5397 = vmatprep.subr.bf16.mxu0 %v6058_v3 }
 0x108   : > { %5171 = vmatmul.mubr.msk.f32.vlgmr.msra.gmra.mrb[38].mxu0 %vm360_vm0, %v6261_v42 }
 0x109   : > { %5399 = vmatpush3.bf16.msra.mxu0 %v6058_v3  ;;  %5184 = vmatprep.mubr.msk.f32.mxu0 %vm360_vm0, %v6265_v43 }
 0x10a   : > { %5405 = vmatprep.subr.bf16.mxu0 %v6058_v3 }
 0x10c   : > { %5185 = vmatmul.mubr.msk.f32.vlgmr.msra.gmra.mrb[40].mxu0 %vm360_vm0, %v6273_v44 }
 0x10d   : > { %5407 = vmatpush3.bf16.msra.mxu0 %v6058_v3  ;;  %5198 = vmatprep.mubr.msk.f32.mxu0 %vm360_vm0, %v3874_v45 }
 0x10e   : > { %5413 = vmatprep.subr.bf16.mxu0 %v6058_v3 }
 0x110   : > { %5199 = vmatmul.mubr.msk.f32.vlgmr.msra.gmra.mrb[42].mxu0 %vm360_vm0, %v3875_v46 }
 0x111   : > { %5415 = vmatpush3.bf16.msra.mxu0 %v6058_v3  ;;  %5212 = vmatprep.mubr.msk.f32.mxu0 %vm360_vm0, %v4032_v47 }
 0x112   : > { %5421 = vmatprep.subr.bf16.mxu0 %v6058_v3 }
 0x114   : > { %5213 = vmatmul.mubr.msk.f32.vlgmr.msra.gmra.mrb[44].mxu0 %vm360_vm0, %v4033_v48 }
 0x115   : > { %5423 = vmatpush3.bf16.msra.mxu0 %v6058_v3  ;;  %5226 = vmatprep.mubr.msk.f32.mxu0 %vm360_vm0, %v4190_v49 }
 0x118   : > { %5227 = vmatmul.mubr.msk.f32.vlgmr.msra.gmra.mrb[46].mxu0 %vm360_vm0, %v4191_v50 }
 0x18f   : > { %v4906_v52 = vpop.f32.mrb[0].mxu0 }
 0x190   : > { %v433_v53 = vpop.f32.mrb[1].mxu0 }
 0x191   : > { %v5240_v54 = vpack.c.bf16 %v4906_v52, %v433_v53 }
 0x193   : > { %5241 = vmatprep.subr.bf16.mxu1 %v5240_v54  ;;  %v4920_v55 = vpop.f32.mrb[2].mxu0 }
 0x194   : > { %5243 = vmatpush3.bf16.msra.mxu1 %v5240_v54  ;;  %v595_v56 = vpop.f32.mrb[3].mxu0 }
 0x195   : > { %v5248_v58 = vpack.c.bf16 %v4920_v55, %v595_v56 }
 0x197   : > { %4912 = vmatmul.mubr.msk.f32.vlgmr.msra.gmra.mrb[0].mxu1 %vm360_vm0, %v6305_v57  ;;  %5249 = vmatprep.subr.bf16.mxu1 %v5248_v58  ;;  %v4934_v59 = vpop.f32.mrb[4].mxu0 }
 0x198   : > { %5251 = vmatpush3.bf16.msra.mxu1 %v5248_v58  ;;  %v751_v60 = vpop.f32.mrb[5].mxu0  ;;  %4925 = vmatprep.mubr.msk.f32.mxu1 %vm360_vm0, %v6300_v51 }
 0x199   : > { %v5256_v61 = vpack.c.bf16 %v4934_v59, %v751_v60 }
 0x19b   : > { %4926 = vmatmul.mubr.msk.f32.vlgmr.msra.gmra.mrb[2].mxu1 %vm360_vm0, %v6305_v57  ;;  %5257 = vmatprep.subr.bf16.mxu1 %v5256_v61  ;;  %v4948_v62 = vpop.f32.mrb[6].mxu0 }
 0x19c   : > { %5259 = vmatpush3.bf16.msra.mxu1 %v5256_v61  ;;  %v909_v63 = vpop.f32.mrb[7].mxu0  ;;  %4939 = vmatprep.mubr.msk.f32.mxu1 %vm360_vm0, %v6300_v51 }
 0x19d   : > { %v5264_v0 = vpack.c.bf16 %v4948_v62, %v909_v63 }
 0x19f   : > { %4940 = vmatmul.mubr.msk.f32.vlgmr.msra.gmra.mrb[4].mxu1 %vm360_vm0, %v6305_v57  ;;  %5265 = vmatprep.subr.bf16.mxu1 %v5264_v0  ;;  %v4962_v1 = vpop.f32.mrb[8].mxu0 }
 0x1a0   : > { %5267 = vmatpush3.bf16.msra.mxu1 %v5264_v0  ;;  %v1067_v3 = vpop.f32.mrb[9].mxu0  ;;  %4953 = vmatprep.mubr.msk.f32.mxu1 %vm360_vm0, %v6300_v51 }
 0x1a1   : > { %v5272_v9 = vpack.c.bf16 %v4962_v1, %v1067_v3 }
 0x1a3   : > { %4954 = vmatmul.mubr.msk.f32.vlgmr.msra.gmra.mrb[6].mxu1 %vm360_vm0, %v6305_v57  ;;  %5273 = vmatprep.subr.bf16.mxu1 %v5272_v9  ;;  %v4976_v10 = vpop.f32.mrb[10].mxu0 }
 0x1a4   : > { %5275 = vmatpush3.bf16.msra.mxu1 %v5272_v9  ;;  %v1225_v11 = vpop.f32.mrb[11].mxu0  ;;  %4967 = vmatprep.mubr.msk.f32.mxu1 %vm360_vm0, %v6300_v51 }
 0x1a5   : > { %v5280_v12 = vpack.c.bf16 %v4976_v10, %v1225_v11 }
 0x1a7   : > { %4968 = vmatmul.mubr.msk.f32.vlgmr.msra.gmra.mrb[8].mxu1 %vm360_vm0, %v6305_v57  ;;  %5281 = vmatprep.subr.bf16.mxu1 %v5280_v12  ;;  %v4990_v13 = vpop.f32.mrb[12].mxu0 }
 0x1a8   : > { %5283 = vmatpush3.bf16.msra.mxu1 %v5280_v12  ;;  %v1452_v14 = vpop.f32.mrb[13].mxu0  ;;  %4981 = vmatprep.mubr.msk.f32.mxu1 %vm360_vm0, %v6300_v51 }
 0x1a9   : > { %v5288_v21 = vpack.c.bf16 %v4990_v13, %v1452_v14 }
 0x1ab   : > { %4982 = vmatmul.mubr.msk.f32.vlgmr.msra.gmra.mrb[10].mxu1 %vm360_vm0, %v6305_v57  ;;  %5289 = vmatprep.subr.bf16.mxu1 %v5288_v21  ;;  %v5004_v22 = vpop.f32.mrb[14].mxu0 }
 0x1ac   : > { %5291 = vmatpush3.bf16.msra.mxu1 %v5288_v21  ;;  %v1608_v23 = vpop.f32.mrb[15].mxu0  ;;  %4995 = vmatprep.mubr.msk.f32.mxu1 %vm360_vm0, %v6300_v51 }
 0x1ad   : > { %v5296_v24 = vpack.c.bf16 %v5004_v22, %v1608_v23 }
 0x1af   : > { %4996 = vmatmul.mubr.msk.f32.vlgmr.msra.gmra.mrb[12].mxu1 %vm360_vm0, %v6305_v57  ;;  %5297 = vmatprep.subr.bf16.mxu1 %v5296_v24  ;;  %v5018_v25 = vpop.f32.mrb[16].mxu0 }
 0x1b0   : > { %5299 = vmatpush3.bf16.msra.mxu1 %v5296_v24  ;;  %v1764_v26 = vpop.f32.mrb[17].mxu0  ;;  %5009 = vmatprep.mubr.msk.f32.mxu1 %vm360_vm0, %v6300_v51 }
 0x1b1   : > { %v5304_v33 = vpack.c.bf16 %v5018_v25, %v1764_v26 }
 0x1b3   : > { %5010 = vmatmul.mubr.msk.f32.vlgmr.msra.gmra.mrb[14].mxu1 %vm360_vm0, %v6305_v57  ;;  %5305 = vmatprep.subr.bf16.mxu1 %v5304_v33  ;;  %v5032_v34 = vpop.f32.mrb[18].mxu0 }
 0x1b4   : > { %5307 = vmatpush3.bf16.msra.mxu1 %v5304_v33  ;;  %v1922_v35 = vpop.f32.mrb[19].mxu0  ;;  %5023 = vmatprep.mubr.msk.f32.mxu1 %vm360_vm0, %v6300_v51 }
 0x1b5   : > { %v5312_v36 = vpack.c.bf16 %v5032_v34, %v1922_v35 }
 0x1b7   : > { %5024 = vmatmul.mubr.msk.f32.vlgmr.msra.gmra.mrb[16].mxu1 %vm360_vm0, %v6305_v57  ;;  %5313 = vmatprep.subr.bf16.mxu1 %v5312_v36  ;;  %v5046_v37 = vpop.f32.mrb[20].mxu0 }
 0x1b8   : > { %5315 = vmatpush3.bf16.msra.mxu1 %v5312_v36  ;;  %v2080_v38 = vpop.f32.mrb[21].mxu0  ;;  %5037 = vmatprep.mubr.msk.f32.mxu1 %vm360_vm0, %v6300_v51 }
 0x1b9   : > { %v5320_v45 = vpack.c.bf16 %v5046_v37, %v2080_v38 }
 0x1bb   : > { %5038 = vmatmul.mubr.msk.f32.vlgmr.msra.gmra.mrb[18].mxu1 %vm360_vm0, %v6305_v57  ;;  %5321 = vmatprep.subr.bf16.mxu1 %v5320_v45  ;;  %v5060_v46 = vpop.f32.mrb[22].mxu0 }
 0x1bc   : > { %5323 = vmatpush3.bf16.msra.mxu1 %v5320_v45  ;;  %v2238_v47 = vpop.f32.mrb[23].mxu0  ;;  %5051 = vmatprep.mubr.msk.f32.mxu1 %vm360_vm0, %v6300_v51 }
 0x1bd   : > { %v5328_v48 = vpack.c.bf16 %v5060_v46, %v2238_v47 }
 0x1bf   : > { %5052 = vmatmul.mubr.msk.f32.vlgmr.msra.gmra.mrb[20].mxu1 %vm360_vm0, %v6305_v57  ;;  %5329 = vmatprep.subr.bf16.mxu1 %v5328_v48  ;;  %v5074_v49 = vpop.f32.mrb[24].mxu0 }
 0x1c0   : > { %5331 = vmatpush3.bf16.msra.mxu1 %v5328_v48  ;;  %v2465_v50 = vpop.f32.mrb[25].mxu0  ;;  %5065 = vmatprep.mubr.msk.f32.mxu1 %vm360_vm0, %v6300_v51 }
 0x1c1   : > { %v5336_v52 = vpack.c.bf16 %v5074_v49, %v2465_v50 }
 0x1c3   : > { %5066 = vmatmul.mubr.msk.f32.vlgmr.msra.gmra.mrb[22].mxu1 %vm360_vm0, %v6305_v57  ;;  %5337 = vmatprep.subr.bf16.mxu1 %v5336_v52  ;;  %v5088_v53 = vpop.f32.mrb[26].mxu0 }
 0x1c4   : > { %5339 = vmatpush3.bf16.msra.mxu1 %v5336_v52  ;;  %v2621_v54 = vpop.f32.mrb[27].mxu0  ;;  %5079 = vmatprep.mubr.msk.f32.mxu1 %vm360_vm0, %v6300_v51 }
 0x1c5   : > { %v5344_v55 = vpack.c.bf16 %v5088_v53, %v2621_v54 }
 0x1c7   : > { %5080 = vmatmul.mubr.msk.f32.vlgmr.msra.gmra.mrb[24].mxu1 %vm360_vm0, %v6305_v57  ;;  %5345 = vmatprep.subr.bf16.mxu1 %v5344_v55  ;;  %v5102_v56 = vpop.f32.mrb[28].mxu0 }
 0x1c8   : > { %5347 = vmatpush3.bf16.msra.mxu1 %v5344_v55  ;;  %v2777_v58 = vpop.f32.mrb[29].mxu0  ;;  %5093 = vmatprep.mubr.msk.f32.mxu1 %vm360_vm0, %v6300_v51 }
 0x1c9   : > { %v5352_v59 = vpack.c.bf16 %v5102_v56, %v2777_v58 }
 0x1cb   : > { %5094 = vmatmul.mubr.msk.f32.vlgmr.msra.gmra.mrb[26].mxu1 %vm360_vm0, %v6305_v57  ;;  %5353 = vmatprep.subr.bf16.mxu1 %v5352_v59  ;;  %v5116_v60 = vpop.f32.mrb[30].mxu0 }
 0x1cc   : > { %5355 = vmatpush3.bf16.msra.mxu1 %v5352_v59  ;;  %v2935_v61 = vpop.f32.mrb[31].mxu0  ;;  %5107 = vmatprep.mubr.msk.f32.mxu1 %vm360_vm0, %v6300_v51 }
 0x1cd   : > { %v5360_v62 = vpack.c.bf16 %v5116_v60, %v2935_v61 }
 0x1cf   : > { %5108 = vmatmul.mubr.msk.f32.vlgmr.msra.gmra.mrb[28].mxu1 %vm360_vm0, %v6305_v57  ;;  %5361 = vmatprep.subr.bf16.mxu1 %v5360_v62  ;;  %v5130_v63 = vpop.f32.mrb[32].mxu0 }
 0x1d0   : > { %5363 = vmatpush3.bf16.msra.mxu1 %v5360_v62  ;;  %v3093_v0 = vpop.f32.mrb[33].mxu0  ;;  %5121 = vmatprep.mubr.msk.f32.mxu1 %vm360_vm0, %v6300_v51 }
 0x1d1   : > { %v5368_v1 = vpack.c.bf16 %v5130_v63, %v3093_v0 }
 0x1d3   : > { %5122 = vmatmul.mubr.msk.f32.vlgmr.msra.gmra.mrb[30].mxu1 %vm360_vm0, %v6305_v57  ;;  %5369 = vmatprep.subr.bf16.mxu1 %v5368_v1  ;;  %v5144_v3 = vpop.f32.mrb[34].mxu0 }
 0x1d4   : > { %5371 = vmatpush3.bf16.msra.mxu1 %v5368_v1  ;;  %v3251_v9 = vpop.f32.mrb[35].mxu0  ;;  %5135 = vmatprep.mubr.msk.f32.mxu1 %vm360_vm0, %v6300_v51 }
 0x1d5   : > { %v5376_v10 = vpack.c.bf16 %v5144_v3, %v3251_v9 }
 0x1d7   : > { %5136 = vmatmul.mubr.msk.f32.vlgmr.msra.gmra.mrb[32].mxu1 %vm360_vm0, %v6305_v57  ;;  %5377 = vmatprep.subr.bf16.mxu1 %v5376_v10  ;;  %v5158_v11 = vpop.f32.mrb[36].mxu0 }
 0x1d8   : > { %5379 = vmatpush3.bf16.msra.mxu1 %v5376_v10  ;;  %v3478_v12 = vpop.f32.mrb[37].mxu0  ;;  %5149 = vmatprep.mubr.msk.f32.mxu1 %vm360_vm0, %v6300_v51 }
 0x1d9   : > { %v5384_v13 = vpack.c.bf16 %v5158_v11, %v3478_v12 }
 0x1db   : > { %5150 = vmatmul.mubr.msk.f32.vlgmr.msra.gmra.mrb[34].mxu1 %vm360_vm0, %v6305_v57  ;;  %5385 = vmatprep.subr.bf16.mxu1 %v5384_v13  ;;  %v5172_v14 = vpop.f32.mrb[38].mxu0 }
 0x1dc   : > { %5387 = vmatpush3.bf16.msra.mxu1 %v5384_v13  ;;  %v3634_v21 = vpop.f32.mrb[39].mxu0  ;;  %5163 = vmatprep.mubr.msk.f32.mxu1 %vm360_vm0, %v6300_v51 }
 0x1dd   : > { %v5392_v22 = vpack.c.bf16 %v5172_v14, %v3634_v21 }
 0x1df   : > { %5164 = vmatmul.mubr.msk.f32.vlgmr.msra.gmra.mrb[36].mxu1 %vm360_vm0, %v6305_v57  ;;  %5393 = vmatprep.subr.bf16.mxu1 %v5392_v22  ;;  %v5186_v23 = vpop.f32.mrb[40].mxu0 }
 0x1e0   : > { %5395 = vmatpush3.bf16.msra.mxu1 %v5392_v22  ;;  %v3790_v24 = vpop.f32.mrb[41].mxu0  ;;  %5177 = vmatprep.mubr.msk.f32.mxu1 %vm360_vm0, %v6300_v51 }
 0x1e1   : > { %v5400_v25 = vpack.c.bf16 %v5186_v23, %v3790_v24 }
 0x1e3   : > { %5178 = vmatmul.mubr.msk.f32.vlgmr.msra.gmra.mrb[38].mxu1 %vm360_vm0, %v6305_v57  ;;  %5401 = vmatprep.subr.bf16.mxu1 %v5400_v25  ;;  %v5200_v26 = vpop.f32.mrb[42].mxu0 }
 0x1e4   : > { %5403 = vmatpush3.bf16.msra.mxu1 %v5400_v25  ;;  %v3948_v33 = vpop.f32.mrb[43].mxu0  ;;  %5191 = vmatprep.mubr.msk.f32.mxu1 %vm360_vm0, %v6300_v51 }
 0x1e5   : > { %v5408_v34 = vpack.c.bf16 %v5200_v26, %v3948_v33 }
 0x1e7   : > { %5192 = vmatmul.mubr.msk.f32.vlgmr.msra.gmra.mrb[40].mxu1 %vm360_vm0, %v6305_v57  ;;  %5409 = vmatprep.subr.bf16.mxu1 %v5408_v34  ;;  %v5214_v35 = vpop.f32.mrb[44].mxu0 }
 0x1e8   : > { %5411 = vmatpush3.bf16.msra.mxu1 %v5408_v34  ;;  %v4106_v36 = vpop.f32.mrb[45].mxu0  ;;  %5205 = vmatprep.mubr.msk.f32.mxu1 %vm360_vm0, %v6300_v51 }
 0x1e9   : > { %v5416_v37 = vpack.c.bf16 %v5214_v35, %v4106_v36 }
 0x1eb   : > { %5206 = vmatmul.mubr.msk.f32.vlgmr.msra.gmra.mrb[42].mxu1 %vm360_vm0, %v6305_v57  ;;  %5417 = vmatprep.subr.bf16.mxu1 %v5416_v37  ;;  %v5228_v38 = vpop.f32.mrb[46].mxu0 }
 0x1ec   : > { %5419 = vmatpush3.bf16.msra.mxu1 %v5416_v37  ;;  %v4264_v45 = vpop.f32.mrb[47].mxu0  ;;  %5219 = vmatprep.mubr.msk.f32.mxu1 %vm360_vm0, %v6300_v51 }
 0x1ed   : > { %v5424_v46 = vpack.c.bf16 %v5228_v38, %v4264_v45 }
 0x1ef   : > { %5220 = vmatmul.mubr.msk.f32.vlgmr.msra.gmra.mrb[44].mxu1 %vm360_vm0, %v6305_v57  ;;  %5425 = vmatprep.subr.bf16.mxu1 %v5424_v46 }
 0x1f0   : > { %5427 = vmatpush3.bf16.msra.mxu1 %v5424_v46  ;;  %5233 = vmatprep.mubr.msk.f32.mxu1 %vm360_vm0, %v6300_v51 }
 0x1f3   : > { %5234 = vmatmul.mubr.msk.f32.vlgmr.msra.gmra.mrb[46].mxu1 %vm360_vm0, %v6305_v57 }
 0x26a   : > { %v4913_v47 = vpop.f32.mrb[0].mxu1 }
 0x26b   : > { %v514_v48 = vpop.f32.mrb[1].mxu1  ;;  %v1316_v49 = vsub.f32 %v6065_v4, %v4913_v47  ;;  %v1334_v1 = vmul.f32 2.0, %v4913_v47 }
 0x26c   : > { %v1315_v50 = vsub.f32 %v6056_v2, %v514_v48  ;;  %v1333_v10 = vmul.f32 2.0, %v514_v48  ;;  %v1309_v13 = vmul.f32 %v514_v48, %v514_v48 }
 0x26d   : > { %v1318_v59 = vand.u32 2147483647, %v1316_v49  ;;  %v1336_v25 = vadd.f32 0.0001, %v1334_v1 }
 0x26e   : > { %v4927_v52 = vpop.f32.mrb[2].mxu1  ;;  %v1317_v51 = vand.u32 2147483647, %v1315_v50  ;;  %v1335_v33 = vadd.f32 0.0001, %v1333_v10  ;;  %v1349_v46 = vadd.f32 1.0, %v1309_v13 }
 0x26f   : > { %v1314_v53 = vmul.f32 %v4927_v52, %v4913_v47  ;;  %v1320_v54 = vsub.f32 %v6079_v6, %v4927_v52  ;;  %v670_v55 = vpop.f32.mrb[3].mxu1  ;;  %v1338_v9 = vmul.f32 2.0, %v1318_v59  ;;  %v1310_v6 = vmul.f32 %v4913_v47, %v4913_v47 }
 0x270   : > { %v1313_v56 = vmul.f32 %v670_v55, %v514_v48  ;;  %v1319_v58 = vsub.f32 %v6071_v5, %v670_v55  ;;  %v1337_v12 = vmul.f32 2.0, %v1317_v51 }
 0x271   : > { %v1322_v60 = vand.u32 2147483647, %v1320_v54  ;;  %v1350_v36 = vadd.f32 1.0, %v1310_v6 }
 0x272   : > { %v1321_v61 = vand.u32 2147483647, %v1319_v58  ;;  %v4941_v62 = vpop.f32.mrb[4].mxu1 }
 0x273   : > { %v1360_v57 = vmul.f32 %v1322_v60, %v1318_v59  ;;  %v1324_v63 = vsub.f32 %v6093_v8, %v4941_v62  ;;  %v826_v0 = vpop.f32.mrb[5].mxu1  ;;  %v1312_v8 = vmul.f32 %v4941_v62, %v4941_v62  ;;  %v1352_v54 = vadd.f32 0.0001, %v1350_v36 }
 0x274   : > { %v1359_v4 = vmul.f32 %v1321_v61, %v1317_v51  ;;  %v1323_v2 = vsub.f32 %v6085_v7, %v826_v0  ;;  %v1311_v34 = vmul.f32 %v826_v0, %v826_v0  ;;  %v1351_v60 = vadd.f32 0.0001, %v1349_v46 }
 0x275   : > { %v1326_v3 = vand.u32 2147483647, %v1324_v63  ;;  %v1362_v62 = vadd.f32 0.00045, %v1360_v57 }
 0x276   : > { %v1325_v11 = vand.u32 2147483647, %v1323_v2  ;;  %v4955_v5 = vpop.f32.mrb[6].mxu1  ;;  %v1361_v2 = vadd.f32 0.00045, %v1359_v4 }
 0x277   : > { %v1340_v14 = vmul.f32 %v1338_v9, %v1326_v3  ;;  %v1328_v21 = vsub.f32 %v4955_v5, %v1310_v6  ;;  %v984_v22 = vpop.f32.mrb[7].mxu1 }
 0x278   : > { %v1339_v23 = vmul.f32 %v1337_v12, %v1325_v11  ;;  %v1327_v24 = vsub.f32 %v984_v22, %v1309_v13 }
 0x279   : > { %v1342_v26 = vadd.f32 0.0009, %v1340_v14 }
 0x27a   : > { %v1341_v7 = vadd.f32 0.0009, %v1339_v23  ;;  %v4969_v35 = vpop.f32.mrb[8].mxu1 }
 0x27b   : > { %v1330_v37 = vsub.f32 %v4969_v35, %v1312_v8  ;;  %v1142_v38 = vpop.f32.mrb[9].mxu1  ;;  %v1344_v45 = vmul.f32 %v1342_v26, %v1336_v25 }
 0x27c   : > { %v1329_v47 = vsub.f32 %v1142_v38, %v1311_v34  ;;  %v1343_v49 = vmul.f32 %v1341_v7, %v1335_v33 }
 0x27d   : > { %v1354_v48 = vadd.f32 %v1330_v37, %v1328_v21 }
 0x27e   : > { %v1353_v50 = vadd.f32 %v1329_v47, %v1327_v24  ;;  %v4983_v52 = vpop.f32.mrb[10].mxu1 }
 0x27f   : > { %v1356_v55 = vadd.f32 0.0009, %v1354_v48  ;;  %v1332_v58 = vsub.f32 %v4983_v52, %v1314_v53  ;;  %v1300_v59 = vpop.f32.mrb[11].mxu1 }
 0x280   : > { %v1355_v51 = vadd.f32 0.0009, %v1353_v50  ;;  %v1331_v61 = vsub.f32 %v1300_v59, %v1313_v56 }
 0x281   : > { %v1358_v63 = vmul.f32 %v1356_v55, %v1352_v54  ;;  %v1346_v0 = vadd.f32 0.00045, %v1332_v58 }
 0x282   : > { %v1357_v1 = vmul.f32 %v1355_v51, %v1351_v60  ;;  %v1345_v3 = vadd.f32 0.00045, %v1331_v61  ;;  %v4997_v9 = vpop.f32.mrb[12].mxu1 }
 0x283   : > { %v1364_v6 = vmul.f32 %v1362_v62, %v1358_v63  ;;  %v1348_v10 = vmul.f32 %v1346_v0, %v1344_v45  ;;  %v1527_v11 = vpop.f32.mrb[13].mxu1  ;;  %v2329_v13 = vsub.f32 %v6129_v16, %v4997_v9  ;;  %v2347_v35 = vmul.f32 2.0, %v4997_v9 }
 0x284   : > { %v1363_v12 = vmul.f32 %v1361_v2, %v1357_v1  ;;  %v1347_v5 = vmul.f32 %v1345_v3, %v1343_v49  ;;  %v2328_v53 = vsub.f32 %v6122_v15, %v1527_v11  ;;  %v2346_v38 = vmul.f32 2.0, %v1527_v11 }
 0x285   : > { %5509 = vrcp.f32 %v1364_v6  ;;  %v2331_v23 = vand.u32 2147483647, %v2329_v13  ;;  %v2322_v47 = vmul.f32 %v1527_v11, %v1527_v11 }
 0x286   : > { %5511 = vrcp.f32 %v1363_v12  ;;  %v5011_v14 = vpop.f32.mrb[14].mxu1  ;;  %v2330_v25 = vand.u32 2147483647, %v2328_v53  ;;  %v2348_v61 = vadd.f32 0.0001, %v2346_v38 }
 0x287   : > { %v2327_v56 = vmul.f32 %v5011_v14, %v4997_v9  ;;  %v2333_v57 = vsub.f32 %v6141_v18, %v5011_v14  ;;  %v1683_v21 = vpop.f32.mrb[15].mxu1  ;;  %v2351_v37 = vmul.f32 2.0, %v2331_v23  ;;  %v2323_v18 = vmul.f32 %v4997_v9, %v4997_v9 }
 0x288   : > { %v2326_v4 = vmul.f32 %v1683_v21, %v1527_v11  ;;  %v2332_v22 = vsub.f32 %v6133_v17, %v1683_v21  ;;  %v2350_v46 = vmul.f32 2.0, %v2330_v25  ;;  %v2362_v6 = vadd.f32 1.0, %v2322_v47 }
 0x289   : > { %v2335_v24 = vand.u32 2147483647, %v2333_v57  ;;  %v2363_v2 = vadd.f32 1.0, %v2323_v18 }
 0x28a   : > { %v2334_v8 = vand.u32 2147483647, %v2332_v22  ;;  %v5025_v26 = vpop.f32.mrb[16].mxu1  ;;  %v2364_v22 = vadd.f32 0.0001, %v2362_v6 }
 0x28b   : > { %v2373_v33 = vmul.f32 %v2335_v24, %v2331_v23  ;;  %v2337_v34 = vsub.f32 %v6153_v20, %v5025_v26  ;;  %v1839_v16 = vpop.f32.mrb[17].mxu1  ;;  %v2325_v60 = vmul.f32 %v5025_v26, %v5025_v26  ;;  %v2365_v14 = vadd.f32 0.0001, %v2363_v2 }
 0x28c   : > { %v2372_v7 = vmul.f32 %v2334_v8, %v2330_v25  ;;  %v2336_v15 = vsub.f32 %v6145_v19, %v1839_v16  ;;  %v2349_v19 = vadd.f32 0.0001, %v2347_v35  ;;  %v2324_v62 = vmul.f32 %v1839_v16, %v1839_v16 }
 0x28d   : > { %v2339_v36 = vand.u32 2147483647, %v2337_v34  ;;  %v2375_v25 = vadd.f32 0.00045, %v2373_v33 }
 0x28e   : > { %v2338_v45 = vand.u32 2147483647, %v2336_v15  ;;  %v5039_v17 = vpop.f32.mrb[18].mxu1  ;;  %v2374_v34 = vadd.f32 0.00045, %v2372_v7 }
 0x28f   : > { %v5510_v49 = vpop.eup %5509  ;;  %v2353_v48 = vmul.f32 %v2351_v37, %v2339_v36  ;;  %v2341_v50 = vsub.f32 %v5039_v17, %v2323_v18  ;;  %v1997_v52 = vpop.f32.mrb[19].mxu1 }
 0x290   : > { %v5512_v54 = vpop.eup %5511  ;;  %v6413_v55 = vmul.f32 %v5510_v49, %v1348_v10  ;;  %v2352_v20 = vmul.f32 %v2350_v46, %v2338_v45  ;;  %v2340_v58 = vsub.f32 %v1997_v52, %v2322_v47 }
 0x291   : > { %v6415_v59 = vmul.f32 %v5512_v54, %v1347_v5  ;;  %v2355_v51 = vadd.f32 0.0009, %v2353_v48 }
 0x292   : > { %v2354_v63 = vadd.f32 0.0009, %v2352_v20  ;;  %v5053_v0 = vpop.f32.mrb[20].mxu1 }
 0x293   : > { %v2343_v1 = vsub.f32 %v5053_v0, %v2325_v60  ;;  %v2155_v3 = vpop.f32.mrb[21].mxu1  ;;  %v2357_v9 = vmul.f32 %v2355_v51, %v2349_v19 }
 0x294   : > { %v2342_v11 = vsub.f32 %v2155_v3, %v2324_v62  ;;  %v2356_v12 = vmul.f32 %v2354_v63, %v2348_v61 }
 0x295   : > { %v2367_v10 = vadd.f32 %v2343_v1, %v2341_v50 }
 0x296   : > { %v2366_v13 = vadd.f32 %v2342_v11, %v2340_v58  ;;  %v5067_v53 = vpop.f32.mrb[22].mxu1 }
 0x297   : > { %v2369_v5 = vadd.f32 0.0009, %v2367_v10  ;;  %v2345_v57 = vsub.f32 %v5067_v53, %v2327_v56  ;;  %v2313_v21 = vpop.f32.mrb[23].mxu1 }
 0x298   : > { %v2368_v23 = vadd.f32 0.0009, %v2366_v13  ;;  %v2344_v24 = vsub.f32 %v2313_v21, %v2326_v4 }
 0x299   : > { %v2371_v8 = vmul.f32 %v2369_v5, %v2365_v14  ;;  %v2359_v26 = vadd.f32 0.00045, %v2345_v57 }
 0x29a   : > { %v2370_v16 = vmul.f32 %v2368_v23, %v2364_v22  ;;  %v2358_v15 = vadd.f32 0.00045, %v2344_v24  ;;  %v5081_v35 = vpop.f32.mrb[24].mxu1 }
 0x29b   : > { %v2377_v36 = vmul.f32 %v2375_v25, %v2371_v8  ;;  %v2361_v37 = vmul.f32 %v2359_v26, %v2357_v9  ;;  %v2540_v18 = vpop.f32.mrb[25].mxu1  ;;  %v3342_v46 = vsub.f32 %v6189_v28, %v5081_v35  ;;  %v3360_v51 = vmul.f32 2.0, %v5081_v35 }
 0x29c   : > { %v2376_v38 = vmul.f32 %v2374_v34, %v2370_v16  ;;  %v2360_v45 = vmul.f32 %v2358_v15, %v2356_v12  ;;  %v3341_v56 = vsub.f32 %v6182_v27, %v2540_v18  ;;  %v3359_v63 = vmul.f32 2.0, %v2540_v18 }
 0x29d   : > { %5513 = vrcp.f32 %v2377_v36  ;;  %v3344_v48 = vand.u32 2147483647, %v3342_v46  ;;  %v3335_v1 = vmul.f32 %v2540_v18, %v2540_v18  ;;  %v3362_v14 = vadd.f32 0.0001, %v3360_v51 }
 0x29e   : > { %5515 = vrcp.f32 %v2376_v38  ;;  %v5095_v17 = vpop.f32.mrb[26].mxu1  ;;  %v3343_v52 = vand.u32 2147483647, %v3341_v56  ;;  %v3361_v21 = vadd.f32 0.0001, %v3359_v63 }
 0x29f   : > { %v3340_v4 = vmul.f32 %v5095_v17, %v5081_v35  ;;  %v3346_v33 = vsub.f32 %v6201_v30, %v5095_v17  ;;  %v2696_v47 = vpop.f32.mrb[27].mxu1  ;;  %v3364_v62 = vmul.f32 2.0, %v3344_v48  ;;  %v3336_v30 = vmul.f32 %v5081_v35, %v5081_v35 }
 0x2a0   : > { %v3339_v7 = vmul.f32 %v2696_v47, %v2540_v18  ;;  %v3345_v49 = vsub.f32 %v6193_v29, %v2696_v47  ;;  %v3363_v2 = vmul.f32 2.0, %v3343_v52  ;;  %v3375_v15 = vadd.f32 1.0, %v3335_v1 }
 0x2a1   : > { %v3348_v50 = vand.u32 2147483647, %v3346_v33  ;;  %v3376_v8 = vadd.f32 1.0, %v3336_v30 }
 0x2a2   : > { %v3347_v54 = vand.u32 2147483647, %v3345_v49  ;;  %v5109_v20 = vpop.f32.mrb[28].mxu1  ;;  %v3377_v17 = vadd.f32 0.0001, %v3375_v15 }
 0x2a3   : > { %v3386_v58 = vmul.f32 %v3348_v50, %v3344_v48  ;;  %v3350_v19 = vsub.f32 %v6213_v32, %v5109_v20  ;;  %v2852_v28 = vpop.f32.mrb[29].mxu1 }
 0x2a4   : > { %v3385_v60 = vmul.f32 %v3347_v54, %v3343_v52  ;;  %v3349_v27 = vsub.f32 %v6205_v31, %v2852_v28  ;;  %v3338_v31 = vmul.f32 %v5109_v20, %v5109_v20  ;;  %v3337_v22 = vmul.f32 %v2852_v28, %v2852_v28 }
 0x2a5   : > { %v3352_v61 = vand.u32 2147483647, %v3350_v19  ;;  %v3388_v49 = vadd.f32 0.00045, %v3386_v58 }
 0x2a6   : > { %v3351_v0 = vand.u32 2147483647, %v3349_v27  ;;  %v5123_v29 = vpop.f32.mrb[30].mxu1  ;;  %v3387_v50 = vadd.f32 0.00045, %v3385_v60 }
 0x2a7   : > { %v5514_v3 = vpop.eup %5513  ;;  %v3366_v9 = vmul.f32 %v3364_v62, %v3352_v61  ;;  %v3354_v6 = vsub.f32 %v5123_v29, %v3336_v30  ;;  %v3010_v11 = vpop.f32.mrb[31].mxu1 }
 0x2a8   : > { %v5516_v12 = vpop.eup %5515  ;;  %v2381_v10 = vmul.f32 %v5514_v3, %v2361_v37  ;;  %v3365_v32 = vmul.f32 %v3363_v2, %v3351_v0  ;;  %v3353_v13 = vsub.f32 %v3010_v11, %v3335_v1 }
 0x2a9   : > { %v2380_v53 = vmul.f32 %v5516_v12, %v2360_v45  ;;  %v3368_v5 = vadd.f32 0.0009, %v3366_v9  ;;  %v3378_v45 = vadd.f32 0.0001, %v3376_v8 }
 0x2aa   : > { %v6424_v57 = vadd.f32 %v2381_v10, %v6413_v55  ;;  %v3367_v23 = vadd.f32 0.0009, %v3365_v32  ;;  %v5137_v24 = vpop.f32.mrb[32].mxu1 }
 0x2ab   : > { %v6427_v25 = vadd.f32 %v2380_v53, %v6415_v59  ;;  %v3356_v26 = vsub.f32 %v5137_v24, %v3338_v31  ;;  %v3168_v34 = vpop.f32.mrb[33].mxu1  ;;  %v3370_v16 = vmul.f32 %v3368_v5, %v3362_v14 }
 0x2ac   : > { %v3355_v35 = vsub.f32 %v3168_v34, %v3337_v22  ;;  %v3369_v36 = vmul.f32 %v3367_v23, %v3361_v21 }
 0x2ad   : > { %v3380_v37 = vadd.f32 %v3356_v26, %v3354_v6 }
 0x2ae   : > { %v3379_v18 = vadd.f32 %v3355_v35, %v3353_v13  ;;  %v5151_v38 = vpop.f32.mrb[34].mxu1 }
 0x2af   : > { %v3382_v55 = vadd.f32 0.0009, %v3380_v37  ;;  %v3358_v46 = vsub.f32 %v5151_v38, %v3340_v4  ;;  %v3326_v56 = vpop.f32.mrb[35].mxu1 }
 0x2b0   : > { %v3381_v33 = vadd.f32 0.0009, %v3379_v18  ;;  %v3357_v47 = vsub.f32 %v3326_v56, %v3339_v7 }
 0x2b1   : > { %v3384_v59 = vmul.f32 %v3382_v55, %v3378_v45  ;;  %v3372_v48 = vadd.f32 0.00045, %v3358_v46 }
 0x2b2   : > { %v3383_v52 = vmul.f32 %v3381_v33, %v3377_v17  ;;  %v3371_v54 = vadd.f32 0.00045, %v3357_v47  ;;  %v5165_v20 = vpop.f32.mrb[36].mxu1 }
 0x2b3   : > { %v3390_v19 = vmul.f32 %v3388_v49, %v3384_v59  ;;  %v3374_v28 = vmul.f32 %v3372_v48, %v3370_v16  ;;  %v3553_v27 = vpop.f32.mrb[37].mxu1  ;;  %v4355_v62 = vsub.f32 %v6249_v40, %v5165_v20  ;;  %v4373_v10 = vmul.f32 2.0, %v5165_v20 }
 0x2b4   : > { %v3389_v51 = vmul.f32 %v3387_v50, %v3383_v52  ;;  %v3373_v61 = vmul.f32 %v3371_v54, %v3369_v36  ;;  %v4354_v4 = vsub.f32 %v6242_v39, %v3553_v27  ;;  %v4372_v53 = vmul.f32 2.0, %v3553_v27 }
 0x2b5   : > { %5517 = vrcp.f32 %v3390_v19  ;;  %v4357_v2 = vand.u32 2147483647, %v4355_v62  ;;  %v4348_v5 = vmul.f32 %v3553_v27, %v3553_v27  ;;  %v4375_v15 = vadd.f32 0.0001, %v4373_v10 }
 0x2b6   : > { %5519 = vrcp.f32 %v3389_v51  ;;  %v5179_v30 = vpop.f32.mrb[38].mxu1  ;;  %v4356_v1 = vand.u32 2147483647, %v4354_v4  ;;  %v4374_v37 = vadd.f32 0.0001, %v4372_v53 }
 0x2b7   : > { %v4353_v7 = vmul.f32 %v5179_v30, %v5165_v20  ;;  %v4359_v58 = vsub.f32 %v6261_v42, %v5179_v30  ;;  %v3709_v63 = vpop.f32.mrb[39].mxu1  ;;  %v4377_v13 = vmul.f32 2.0, %v4357_v2  ;;  %v4349_v42 = vmul.f32 %v5165_v20, %v5165_v20 }
 0x2b8   : > { %v4352_v60 = vmul.f32 %v3709_v63, %v3553_v27  ;;  %v4358_v0 = vsub.f32 %v6253_v41, %v3709_v63  ;;  %v4376_v31 = vmul.f32 2.0, %v4356_v1  ;;  %v4388_v47 = vadd.f32 1.0, %v4348_v5 }
 0x2b9   : > { %v4361_v29 = vand.u32 2147483647, %v4359_v58  ;;  %v4389_v46 = vadd.f32 1.0, %v4349_v42 }
 0x2ba   : > { %v4360_v3 = vand.u32 2147483647, %v4358_v0  ;;  %v5193_v9 = vpop.f32.mrb[40].mxu1 }
 0x2bb   : > { %v4399_v6 = vmul.f32 %v4361_v29, %v4357_v2  ;;  %v4363_v11 = vsub.f32 %v6273_v44, %v5193_v9  ;;  %v3865_v40 = vpop.f32.mrb[41].mxu1  ;;  %v4391_v54 = vadd.f32 0.0001, %v4389_v46 }
 0x2bc   : > { %v4398_v12 = vmul.f32 %v4360_v3, %v4356_v1  ;;  %v4362_v39 = vsub.f32 %v6265_v43, %v3865_v40  ;;  %v4351_v43 = vmul.f32 %v5193_v9, %v5193_v9  ;;  %v4350_v18 = vmul.f32 %v3865_v40, %v3865_v40 }
 0x2bd   : > { %v4365_v32 = vand.u32 2147483647, %v4363_v11 }
 0x2be   : > { %v4364_v14 = vand.u32 2147483647, %v4362_v39  ;;  %v5207_v41 = vpop.f32.mrb[42].mxu1  ;;  %v4400_v4 = vadd.f32 0.00045, %v4398_v12 }
 0x2bf   : > { %v5518_v21 = vpop.eup %5517  ;;  %v4379_v22 = vmul.f32 %v4377_v13, %v4365_v32  ;;  %v4367_v23 = vsub.f32 %v5207_v41, %v4349_v42  ;;  %v4023_v24 = vpop.f32.mrb[43].mxu1 }
 0x2c0   : > { %v5520_v8 = vpop.eup %5519  ;;  %v3394_v26 = vmul.f32 %v5518_v21, %v3374_v28  ;;  %v4378_v44 = vmul.f32 %v4376_v31, %v4364_v14  ;;  %v4366_v34 = vsub.f32 %v4023_v24, %v4348_v5  ;;  %v4390_v28 = vadd.f32 0.0001, %v4388_v47 }
 0x2c1   : > { %v3393_v16 = vmul.f32 %v5520_v8, %v3373_v61  ;;  %v4381_v35 = vadd.f32 0.0009, %v4379_v22 }
 0x2c2   : > { %v3396_v36 = vadd.f32 %v3394_v26, %v6424_v57  ;;  %v4380_v38 = vadd.f32 0.0009, %v4378_v44  ;;  %v5221_v45 = vpop.f32.mrb[44].mxu1 }
 0x2c3   : > { %v3395_v55 = vadd.f32 %v3393_v16, %v6427_v25  ;;  %v4369_v56 = vsub.f32 %v5221_v45, %v4351_v43  ;;  %v4181_v17 = vpop.f32.mrb[45].mxu1  ;;  %v4383_v33 = vmul.f32 %v4381_v35, %v4375_v15  ;;  %v4401_v25 = vadd.f32 0.00045, %v4399_v6 }
 0x2c4   : > { %v4368_v49 = vsub.f32 %v4181_v17, %v4350_v18  ;;  %v4382_v59 = vmul.f32 %v4380_v38, %v4374_v37 }
 0x2c5   : > { %v4393_v48 = vadd.f32 %v4369_v56, %v4367_v23 }
 0x2c6   : > { %v4392_v50 = vadd.f32 %v4368_v49, %v4366_v34  ;;  %v5235_v52 = vpop.f32.mrb[46].mxu1 }
 0x2c7   : > { %v4395_v20 = vadd.f32 0.0009, %v4393_v48  ;;  %v4371_v19 = vsub.f32 %v5235_v52, %v4353_v7  ;;  %v4339_v57 = vpop.f32.mrb[47].mxu1 }
 0x2c8   : > { %v4394_v27 = vadd.f32 0.0009, %v4392_v50  ;;  %v4370_v51 = vsub.f32 %v4339_v57, %v4352_v60 }
 0x2c9   : > { %v4397_v61 = vmul.f32 %v4395_v20, %v4391_v54  ;;  %v4385_v62 = vadd.f32 0.00045, %v4371_v19 }
 0x2ca   : > { %v4396_v30 = vmul.f32 %v4394_v27, %v4390_v28  ;;  %v4384_v58 = vadd.f32 0.00045, %v4370_v51 }
 0x2cb   : > { %v4403_v63 = vmul.f32 %v4401_v25, %v4397_v61  ;;  %v4387_v0 = vmul.f32 %v4385_v62, %v4383_v33 }
 0x2cc   : > { %v4402_v2 = vmul.f32 %v4400_v4, %v4396_v30  ;;  %v4386_v29 = vmul.f32 %v4384_v58, %v4382_v59 }
 0x2cd   : > { %5521 = vrcp.f32 %v4403_v63 }
 0x2ce   : > { %5523 = vrcp.f32 %v4402_v2 }
 0x2d7   : > { %v5522_v7 = vpop.eup %5521 }
 0x2d8   : > { %v5524_v60 = vpop.eup %5523  ;;  %v4407_v1 = vmul.f32 %v5522_v7, %v4387_v0 }
 0x2d9   : > { %v4406_v3 = vmul.f32 %v5524_v60, %v4386_v29 }
 0x2da   : > { %v4409_v9 = vadd.f32 %v4407_v1, %v3396_v36 }
 0x2db   : > { %v4408_v6 = vadd.f32 %v4406_v3, %v3395_v55 }
 0x2dc   : > { %4411 = vst.msk [vmem:[%s346_s20 + $0x8] sm:$0xff] %vm360_vm0, %v4409_v9 }
 0x2dd   : > { %4410 = vst.msk [vmem:[%s346_s20] sm:$0xff] %vm360_vm0, %v4408_v6 }
 0x2de   : > { %5684 = shalt.err (!%p5681_p0)
}
 0x2df   : > { %s5685_s16 = scalar_lea.hbm %s6442_s10, 256  ;;  %s5689_s17 = scalar_lea.hbm %s6495_s5, 512 }
 0x2e0   : > { %p5686_p11 = scmp.ne.s32.totalorder %s6442_s10, %s5685_s16  ;;  %p5690_p1 = scmp.lt.u32.totalorder %s6442_s10, %s6495_s5 }
 0x2e1   : > { %p5691_p7 = scmp.lt.u32.totalorder %s5689_s17, %s5685_s16  ;;  %p5693_p8 = scmp.lt.u32.totalorder %s5685_s16, %s6442_s10 }
 0x2e2   : > { %p5687_p12 = pnand %p5686_p11, %p6545_p9 }
 0x2e3   : > { %p5692_p2 = por %p5691_p7, %p5690_p1 }
 0x2e4   : > { %p5688_p3 = pneg %p5687_p12 }
 0x2e5   : > { %p5694_p10 = por %p5693_p8, %p5692_p2 }
 0x2e7   : > { %p5695_p4 = pnand %p5694_p10, %p5688_p3 }
 0x2e9   : > { %5698 = shalt.err (!%p5695_p4)
}
 0x2ea   : > { %s5755_s15 = smov 128   ;;  %s5756_s26 = smov 8  }
 0x2eb   : > { %5442 = dma.vmem_to_hbm [thread:$0]  (%p6545_p9), %s6444_s24, 256, %s6442_s10, %s4413_s22, %s5755_s15, %s5755_s15, %s5756_s26  }
 0x2ec PF: > { %s4441_s29 = sand.u32 1, %s5733_s18   ;;  %p6546_p6 = scmp.ne.s32.totalorder %s6522_s6, 0 }
 0x2ed   : > { %p6547_p13 = scmp.ge.s32.totalorder %s5745_s21, 2  ;;  %s4442_s13 = scalar_lea.sflag [#allocation4], %s4441_s29 }
 0x2ef   : > { %p5462_p5 = pnand %p6547_p13, %p6546_p6 }
 0x2f1   : > { %5728 = dma.done.wait (!%p5462_p5), %s4442_s13, 256  }
 0x2f2   : > { %5730 = vsyncadd (!%p5462_p5), %s4442_s13, 4294967040  ;;  %s6548_s21 = sld [smem:[#allocation16_spill]]  ;;  %s6549_s11 = sld [smem:[#allocation15_spill]] }
 0x2f3   : > { %s6550_s20 = sld [smem:[#allocation17_spill]]  ;;  %s6551_s18 = smov %s5737_s19 }
 0x2f8   : > { %p17_p0 = scmp.ge.s32.totalorder %s6548_s21, 4   ;;  %s6552_s19 = smov %s6549_s11 }
 0x2fa   :  { %19 = sbr.rel (!%p17_p0) target bundleno = 9 (0x9), region = 123 }
 0x301   :  { %4447 = vsyncpa [#allocation3], 1 }
 0x302   :  { %4449 = vsyncpa [#allocation3 + $0x1], 1 }
 0x303   :  { %4450 = vsyncpa [#allocation6], 1 }
 0x304   :  { %4451 = vsyncpa [#allocation4], 1 }
 0x305   :  { %4453 = vsyncpa [#allocation4 + $0x1], 1 }

</bundles_post_ra>
